<compile_context>
chip_gen: v5e
topology: v5e:2x2
jax: 0.10.0
libtpu: 0.0.40
codegen_flags: <defaults>
</compile_context>

<pallas_src>
import jax
import jax.numpy as jnp
from jax.experimental import pallas as pl
from jax.experimental.pallas import tpu as pltpu


def _round_up(x, m):
    return ((x + m - 1) // m) * m


def _linear_kernel(x_ref, w_ref, b_ref, o_ref, acc_ref):
    # x_ref: (tm, tk)  w_ref: (tk, tn)  b_ref: (1, tn)
    # o_ref: (tm, tn)  acc_ref: (tm, tn) f32 scratch
    k = pl.program_id(2)

    @pl.when(k == 0)
    def _():
        acc_ref[...] = jnp.zeros_like(acc_ref)

    acc_ref[...] += jnp.dot(
        x_ref[...], w_ref[...], preferred_element_type=jnp.float32)

    @pl.when(k == pl.num_programs(2) - 1)
    def _():
        # Bias folded into the finalize step only (not re-added per K step).
        o_ref[...] = (acc_ref[...] + b_ref[...]).astype(o_ref.dtype)


def _pallas_linear_2d(x, w_t, b, *, tm=256, tn=256, tk=512):
    """y = x @ w_t + b with a tiled, pipelined Pallas TPU GEMM."""
    M, K = x.shape
    K2, N = w_t.shape
    assert K == K2

    # Shrink tiles for small dims, but keep (8, 128) / MXU alignment.
    tm = min(tm, _round_up(M, 8))
    tn = min(tn, _round_up(N, 128))   # lane-dense output tile
    tk = min(tk, _round_up(K, 128))

    Mp, Np, Kp = _round_up(M, tm), _round_up(N, tn), _round_up(K, tk)

    # Zero-pad so every grid block is full.  K padding is required for
    # correctness of the accumulation; M/N padding is sliced off at the end.
    xp = x if (Mp == M and Kp == K) else jnp.pad(x, ((0, Mp - M), (0, Kp - K)))
    wp = w_t if (Kp == K and Np == N) else jnp.pad(
        w_t, ((0, Kp - K), (0, Np - N)))
    bp = (b if Np == N else jnp.pad(b, (0, Np - N))).reshape(1, Np)

    grid = (Mp // tm, Np // tn, Kp // tk)

    flops = 2 * Mp * Np * Kp
    bytes_accessed = 4 * (Mp * Kp                # activations (read once)
                          + Kp * Np * grid[0]    # weights re-read per M tile
                          + Mp * Np              # output
                          + Np)                  # bias

    out = pl.pallas_call(
        _linear_kernel,
        out_shape=jax.ShapeDtypeStruct((Mp, Np), x.dtype),
        grid_spec=pltpu.PrefetchScalarGridSpec(
            num_scalar_prefetch=0,
            grid=grid,
            in_specs=[
                pl.BlockSpec((tm, tk), lambda i, j, k: (i, k)),
                pl.BlockSpec((tk, tn), lambda i, j, k: (k, j)),
                pl.BlockSpec((1, tn), lambda i, j, k: (0, j)),
            ],
            out_specs=pl.BlockSpec((tm, tn), lambda i, j, k: (i, j)),
            scratch_shapes=[pltpu.VMEM((tm, tn), jnp.float32)],
        ),
        compiler_params=pltpu.CompilerParams(
            dimension_semantics=("parallel", "parallel", "arbitrary"),
            vmem_limit_bytes=32 * 1024 * 1024,
        ),
        cost_estimate=pl.CostEstimate(
            flops=flops, transcendentals=0, bytes_accessed=bytes_accessed),
    )(xp, wp, bp)

    if Mp != M or Np != N:
        out = out[:M, :N]
    return out


# Below this many MACs the MXU is <1% utilized and per-grid-step / custom-call
# overhead dominates; dispatch to plain XLA instead.
_MIN_PALLAS_MACS = 128 * 128 * 128


def linear(x, w_t, b, *, force_pallas=False):
    """y = x @ w_t + b, matching torch.nn.Linear (weight stored transposed).

    Supports arbitrary leading batch dims (like nn.Linear).
    """
    K, N = w_t.shape
    lead = x.shape[:-1]
    x2 = x.reshape(-1, K)
    M = x2.shape[0]

    if (not force_pallas) and (M * N * K < _MIN_PALLAS_MACS):
        y2 = jnp.dot(x2, w_t) + b
    else:
        y2 = _pallas_linear_2d(x2, w_t, b)
    return y2.reshape(*lead, N)


class LRPallas:
    """Pallas equivalent of the PyTorch LR module (a single nn.Linear)."""

    def __init__(self, input_size, output_size, key):
        kw, kb = jax.random.split(key)
        # Deterministic init mimicking nn.Linear's U(-1/sqrt(in), 1/sqrt(in)).
        bound = 1.0 / (input_size ** 0.5)
        # PyTorch weight is (out, in); store transposed (in, out) for the kernel.
        w = jax.random.uniform(kw, (output_size, input_size), jnp.float32,
                               minval=-bound, maxval=bound)
        self.w_t = jnp.asarray(w.T)                       # (in, out)
        self.b = jax.random.uniform(kb, (output_size,), jnp.float32,
                                    minval=-bound, maxval=bound)

    def __call__(self, x, *, force_pallas=False):
        return linear(x, self.w_t, self.b, force_pallas=force_pallas)


if __name__ == "__main__":
    key = jax.random.PRNGKey(0)
    k1, k2, k3, kp1, kp2, kp3 = jax.random.split(key, 6)

    # 1) MXU-scale, tile-aligned case -> Pallas path.
    M, K, N = 256, 512, 256
    x = jax.random.normal(k1, (M, K), jnp.float32)
    model = LRPallas(K, N, kp1)
    y = jax.block_until_ready(model(x))
    y_ref = x @ model.w_t + model.b
    assert y.shape == (M, N)
    assert jnp.allclose(y, y_ref, atol=1e-3, rtol=1e-4)

    # 2) Unaligned shapes -> exercises zero-padding + lane-dense N padding.
    M2, K2, N2 = 200, 384, 130
    x2 = jax.random.normal(k2, (M2, K2), jnp.float32)
    model2 = LRPallas(K2, N2, kp2)
    y2 = jax.block_until_ready(model2(x2, force_pallas=True))
    y2_ref = x2 @ model2.w_t + model2.b
    assert y2.shape == (M2, N2)
    assert jnp.allclose(y2, y2_ref, atol=1e-3, rtol=1e-4)

    # 3) Tiny case like the original demo -> dispatched to plain XLA
    #    (a Pallas kernel is pure overhead at 8x32x16).
    M3, K3, N3 = 8, 32, 16
    x3 = jax.random.normal(k3, (M3, K3), jnp.float32)
    model3 = LRPallas(K3, N3, kp3)
    y3 = jax.block_until_ready(model3(x3))
    y3_ref = x3 @ model3.w_t + model3.b
    assert y3.shape == (M3, N3)
    assert jnp.allclose(y3, y3_ref, atol=1e-5, rtol=1e-5)

    print("KERNEL_OK")
</pallas_src>

<mosaic_0001>
module attributes {stable_mosaic.version = 11 : i64} {
  func.func @_linear_kernel(%arg0: i32, %arg1: i32, %arg2: i32, %arg3: memref<256x512xf32, #tpu.memory_space<vmem>>, %arg4: memref<512x256xf32, #tpu.memory_space<vmem>>, %arg5: memref<1x256xf32, #tpu.memory_space<vmem>>, %arg6: memref<256x256xf32, #tpu.memory_space<vmem>>, %arg7: memref<256x256xf32, #tpu.memory_space<vmem>>) attributes {dimension_semantics = [#tpu.dimension_semantics<parallel>, #tpu.dimension_semantics<parallel>, #tpu.dimension_semantics<arbitrary>], iteration_bounds = array<i64: 1, 1, 1>, scalar_prefetch = 0 : i64, scratch_operands = 1 : i64, tpu.core_type = #tpu.core_type<tc>, window_params = [{transform_indices = @transform_0, window_bounds = array<i64: 256, 512>}, {transform_indices = @transform_1, window_bounds = array<i64: 512, 256>}, {transform_indices = @transform_2, window_bounds = array<i64: 1, 256>}, {transform_indices = @transform_3, window_bounds = array<i64: 256, 256>}]} {
    %c0_i32 = arith.constant 0 : i32
    %0 = arith.cmpi eq, %arg2, %c0_i32 : i32
    %1 = arith.extui %0 : i1 to i32
    %c0_i32_0 = arith.constant 0 : i32
    %2 = arith.cmpi ne, %1, %c0_i32_0 : i32
    scf.if %2 {
      %cst_10 = arith.constant 0.000000e+00 : f32
      %12 = vector.broadcast %cst_10 : f32 to vector<256x256xf32>
      %c0_11 = arith.constant 0 : index
      %c0_12 = arith.constant 0 : index
      %13 = vector.load %arg7[%c0_11, %c0_12] : memref<256x256xf32, #tpu.memory_space<vmem>>, vector<256x256xf32>
      tpu.vector_store %arg7[%c0_11, %c0_12], %12 {strides = array<i32>} : memref<256x256xf32, #tpu.memory_space<vmem>>, vector<256x256xf32>,
    } else {
    }
    %c0 = arith.constant 0 : index
    %c0_1 = arith.constant 0 : index
    %3 = vector.load %arg7[%c0, %c0_1] : memref<256x256xf32, #tpu.memory_space<vmem>>, vector<256x256xf32>
    %c0_2 = arith.constant 0 : index
    %c0_3 = arith.constant 0 : index
    %4 = vector.load %arg3[%c0_2, %c0_3] : memref<256x512xf32, #tpu.memory_space<vmem>>, vector<256x512xf32>
    %c0_4 = arith.constant 0 : index
    %c0_5 = arith.constant 0 : index
    %5 = vector.load %arg4[%c0_4, %c0_5] : memref<512x256xf32, #tpu.memory_space<vmem>>, vector<512x256xf32>
    %cst = arith.constant dense<0.000000e+00> : vector<256x256xf32>
    %6 = tpu.matmul %4, %5, %cst {dimension_numbers = #tpu.dot_dimension_numbers<[1], [0], [0], [1], [0, 0, 1, 1], [], []>} : vector<256x512xf32>, vector<512x256xf32>, vector<256x256xf32> -> vector<256x256xf32>
    %7 = arith.addf %3, %6 : vector<256x256xf32>
    %c0_6 = arith.constant 0 : index
    %c0_7 = arith.constant 0 : index
    %8 = vector.load %arg7[%c0_6, %c0_7] : memref<256x256xf32, #tpu.memory_space<vmem>>, vector<256x256xf32>
    tpu.vector_store %arg7[%c0_6, %c0_7], %7 {strides = array<i32>} : memref<256x256xf32, #tpu.memory_space<vmem>>, vector<256x256xf32>,
    %c0_i32_8 = arith.constant 0 : i32
    %9 = arith.cmpi eq, %arg2, %c0_i32_8 : i32
    %10 = arith.extui %9 : i1 to i32
    %c0_i32_9 = arith.constant 0 : i32
    %11 = arith.cmpi ne, %10, %c0_i32_9 : i32
    scf.if %11 {
      %c0_10 = arith.constant 0 : index
      %c0_11 = arith.constant 0 : index
      %12 = vector.load %arg7[%c0_10, %c0_11] : memref<256x256xf32, #tpu.memory_space<vmem>>, vector<256x256xf32>
      %c0_12 = arith.constant 0 : index
      %c0_13 = arith.constant 0 : index
      %13 = vector.load %arg5[%c0_12, %c0_13] : memref<1x256xf32, #tpu.memory_space<vmem>>, vector<1x256xf32>
      %14 = vector.broadcast %13 : vector<1x256xf32> to vector<256x256xf32>
      %15 = arith.addf %12, %14 : vector<256x256xf32>
      %c0_14 = arith.constant 0 : index
      %c0_15 = arith.constant 0 : index
      %16 = vector.load %arg6[%c0_14, %c0_15] : memref<256x256xf32, #tpu.memory_space<vmem>>, vector<256x256xf32>
      tpu.vector_store %arg6[%c0_14, %c0_15], %15 {strides = array<i32>} : memref<256x256xf32, #tpu.memory_space<vmem>>, vector<256x256xf32>,
    } else {
    }
    return
  }
  func.func @transform_0(%arg0: i32, %arg1: i32, %arg2: i32) -> (i32, i32) {
    %c0_i32 = arith.constant 0 : i32
    return %arg0, %arg2 : i32, i32
  }
  func.func @transform_1(%arg0: i32, %arg1: i32, %arg2: i32) -> (i32, i32) {
    %c0_i32 = arith.constant 0 : i32
    return %arg2, %arg1 : i32, i32
  }
  func.func @transform_2(%arg0: i32, %arg1: i32, %arg2: i32) -> (i32, i32) {
    %c0_i32 = arith.constant 0 : i32
    %c0_i32_0 = arith.constant 0 : i32
    return %c0_i32, %arg1 : i32, i32
  }
  func.func @transform_3(%arg0: i32, %arg1: i32, %arg2: i32) -> (i32, i32) {
    %c0_i32 = arith.constant 0 : i32
    return %arg0, %arg1 : i32, i32
  }
}

</mosaic_0001>

<bundles_post_ra>
// kernel: tpu_custom_call.1
= control target key start
LH: loop header
LB: loop body
LE: loop exit
PB: predicated region body
PF: predicated region fallthrough
CT: control target
= control target key end

     0   :  { %8 = vsyncpa [#allocation4], 0  ;;  %s2210_s0 = inlined_call_operand.hbm [shape: f32[256,512], index: 0, kind: input, shape index: {}]   ;;  %s2211_s1 = inlined_call_operand.hbm [shape: f32[512,256], index: 1, kind: input, shape index: {}]   ;;  %s2212_s2 = inlined_call_operand.hbm [shape: f32[1,256], index: 2, kind: input, shape index: {}]   ;;  %s2213_s3 = inlined_call_operand.hbm [shape: f32[256,256], index: 3, kind: output, shape index: {}]  }
   0x1   :  { %9 = vsyncpa [#allocation7], 0  ;;  %s28_s14 = sshll.u32 %s2211_s1, 4  ;;  %s29_s14 = int_to_ptr.hbm [resolvable:$true] %s28_s14 }
   0x2   :  { %10 = vsyncpa [#allocation5], 0  ;;  %s1888_s15 = smov [#allocation6]   ;;  %s15_s19 = sshll.u32 %s2210_s0, 4  ;;  %s16_s19 = int_to_ptr.hbm [resolvable:$true] %s15_s19 }
   0x3   :  { %s30_s16 = sshll.u32 %s1888_s15, 4  ;;  %s1889_s20 = smov 256   ;;  %s31_s16 = int_to_ptr.vmem [resolvable:$true] %s30_s16 }
   0x4   :  { %s1890_s21 = smov 16   ;;  %s1891_s22 = smov [#allocation3]  }
   0x5   :  { %36 = dma.hbm_to_vmem [thread:$0]  %s29_s14, 16384, %s31_s16, [#allocation7], %s1889_s20, %s1889_s20, %s1890_s21  }
   0x6   :  { %s17_s23 = sshll.u32 %s1891_s22, 4  ;;  %s1892_s1 = smov 512   ;;  %s18_s23 = int_to_ptr.vmem [resolvable:$true] %s17_s23 }
   0x7   :  { %s1893_s24 = smov 32   ;;  %s42_s27 = sshll.u32 %s2212_s2, 4  ;;  %s43_s27 = int_to_ptr.hbm [resolvable:$true] %s42_s27 }
   0x8   :  { %23 = dma.hbm_to_vmem [thread:$0]  %s16_s19, 16384, %s18_s23, [#allocation4], %s1892_s1, %s1892_s1, %s1893_s24  }
   0x9   :  { %s1894_s28 = smov [#allocation8]  }
   0xa   :  { %s44_s0 = sshll.u32 %s1894_s28, 4  ;;  %s45_s0 = int_to_ptr.vmem [resolvable:$true] %s44_s0 }
   0xb   :  { %47 = dma.hbm_to_vmem [thread:$0]  %s43_s27, 32, %s45_s0, [#allocation7]  }
   0xc   :  { %1882 = dma.done.wait [#allocation4], 16384  }
   0xd   :  { %1883 = vsyncadd [#allocation4], 4294950912 }
   0xe   :  { %1884 = dma.done.wait [#allocation7], 16416  }
   0xf   :  { %1885 = vsyncadd [#allocation7], 4294950880  ;;  %v414_v0 = vld [vmem:[#allocation6 + $0x2f0] sm:$0xff]  ;;  %v412_v1 = vld [vmem:[#allocation6 + $0x2e0] sm:$0xff]  ;;  %s1895_s2 = smov [#allocation9]   ;;  %s1687_s5 = sshll.u32 %s2213_s3, 4  ;;  %s1688_s5 = int_to_ptr.hbm [resolvable:$true] %s1687_s5 }
  0x10   :  { %v446_v2 = vld [vmem:[#allocation6 + $0x3f0] sm:$0xff]  ;;  %674 = vmatpush.msra.mxu2 %v414_v0  ;;  %v444_v6 = vld [vmem:[#allocation6 + $0x3e0] sm:$0xff]  ;;  %v195_v63 = vld [vmem:[#allocation3 + $0x18] sm:$0xff]  ;;  %s1685_s29 = sshll.u32 %s1895_s2, 4  ;;  %s1686_s29 = int_to_ptr.vmem [resolvable:$true] %s1685_s29 }
  0x11   :  { %787 = vmatpush.msra.mxu3 %v446_v2  ;;  %v350_v3 = vld [vmem:[#allocation6 + $0xf0] sm:$0xff]  ;;  %v348_v7 = vld [vmem:[#allocation6 + $0xe0] sm:$0xff]  ;;  %v415_v0 = vld [vmem:[#allocation6 + $0x2f8] sm:$0xff] }
  0x12   :  { %v382_v4 = vld [vmem:[#allocation6 + $0x1f0] sm:$0xff]  ;;  %448 = vmatpush.msra.mxu0 %v350_v3  ;;  %v380_v8 = vld [vmem:[#allocation6 + $0x1e0] sm:$0xff]  ;;  %675 = vmatpush.msra.mxu2 %v412_v1  ;;  %v447_v1 = vld [vmem:[#allocation6 + $0x3f8] sm:$0xff] }
  0x13   :  { %v410_v5 = vld [vmem:[#allocation6 + $0x2d0] sm:$0xff]  ;;  %561 = vmatpush.msra.mxu1 %v382_v4  ;;  %788 = vmatpush.msra.mxu3 %v444_v6  ;;  %v408_v11 = vld [vmem:[#allocation6 + $0x2c0] sm:$0xff]  ;;  %v351_v6 = vld [vmem:[#allocation6 + $0xf8] sm:$0xff] }
  0x14   :  { %v442_v9 = vld [vmem:[#allocation6 + $0x3d0] sm:$0xff]  ;;  %449 = vmatpush.msra.mxu0 %v348_v7  ;;  %v440_v13 = vld [vmem:[#allocation6 + $0x3c0] sm:$0xff]  ;;  %676 = vmatpush.msra.mxu2 %v410_v5  ;;  %v193_v5 = vld [vmem:[#allocation3 + $0x8] sm:$0xff] }
  0x15   :  { %v346_v10 = vld [vmem:[#allocation6 + $0xd0] sm:$0xff]  ;;  %562 = vmatpush.msra.mxu1 %v380_v8  ;;  %789 = vmatpush.msra.mxu3 %v442_v9  ;;  %v344_v14 = vld [vmem:[#allocation6 + $0xc0] sm:$0xff]  ;;  %v383_v7 = vld [vmem:[#allocation6 + $0x1f8] sm:$0xff] }
  0x16   :  { %v378_v12 = vld [vmem:[#allocation6 + $0x1d0] sm:$0xff]  ;;  %v376_v15 = vld [vmem:[#allocation6 + $0x1c0] sm:$0xff]  ;;  %450 = vmatpush.msra.mxu0 %v346_v10  ;;  %677 = vmatpush.msra.mxu2 %v408_v11  ;;  %v413_v8 = vld [vmem:[#allocation6 + $0x2e8] sm:$0xff] }
  0x17   :  { %563 = vmatpush.msra.mxu1 %v378_v12  ;;  %v406_v16 = vld [vmem:[#allocation6 + $0x2b0] sm:$0xff]  ;;  %790 = vmatpush.msra.mxu3 %v440_v13  ;;  %v404_v20 = vld [vmem:[#allocation6 + $0x2a0] sm:$0xff]  ;;  %v445_v9 = vld [vmem:[#allocation6 + $0x3e8] sm:$0xff] }
  0x18   :  { %v438_v17 = vld [vmem:[#allocation6 + $0x3b0] sm:$0xff]  ;;  %451 = vmatpush.msra.mxu0 %v344_v14  ;;  %v436_v21 = vld [vmem:[#allocation6 + $0x3a0] sm:$0xff]  ;;  %678 = vmatpush.msra.mxu2 %v406_v16  ;;  %v349_v10 = vld [vmem:[#allocation6 + $0xe8] sm:$0xff] }
  0x19   :  { %v342_v18 = vld [vmem:[#allocation6 + $0xb0] sm:$0xff]  ;;  %564 = vmatpush.msra.mxu1 %v376_v15  ;;  %791 = vmatpush.msra.mxu3 %v438_v17  ;;  %v340_v22 = vld [vmem:[#allocation6 + $0xa0] sm:$0xff]  ;;  %v381_v11 = vld [vmem:[#allocation6 + $0x1e8] sm:$0xff] }
  0x1a   :  { %v374_v19 = vld [vmem:[#allocation6 + $0x1b0] sm:$0xff]  ;;  %v372_v23 = vld [vmem:[#allocation6 + $0x1a0] sm:$0xff]  ;;  %452 = vmatpush.msra.mxu0 %v342_v18  ;;  %679 = vmatpush.msra.mxu2 %v404_v20  ;;  %v411_v12 = vld [vmem:[#allocation6 + $0x2d8] sm:$0xff] }
  0x1b   :  { %565 = vmatpush.msra.mxu1 %v374_v19  ;;  %v402_v24 = vld [vmem:[#allocation6 + $0x290] sm:$0xff]  ;;  %792 = vmatpush.msra.mxu3 %v436_v21  ;;  %v400_v28 = vld [vmem:[#allocation6 + $0x280] sm:$0xff]  ;;  %v443_v13 = vld [vmem:[#allocation6 + $0x3d8] sm:$0xff] }
  0x1c   :  { %v434_v25 = vld [vmem:[#allocation6 + $0x390] sm:$0xff]  ;;  %453 = vmatpush.msra.mxu0 %v340_v22  ;;  %v432_v29 = vld [vmem:[#allocation6 + $0x380] sm:$0xff]  ;;  %680 = vmatpush.msra.mxu2 %v402_v24  ;;  %v199_v15 = vld [vmem:[#allocation3 + $0x38] sm:$0xff] }
  0x1d   :  { %v338_v26 = vld [vmem:[#allocation6 + $0x90] sm:$0xff]  ;;  %566 = vmatpush.msra.mxu1 %v372_v23  ;;  %793 = vmatpush.msra.mxu3 %v434_v25  ;;  %v336_v30 = vld [vmem:[#allocation6 + $0x80] sm:$0xff]  ;;  %v347_v16 = vld [vmem:[#allocation6 + $0xd8] sm:$0xff] }
  0x1e   :  { %v370_v27 = vld [vmem:[#allocation6 + $0x190] sm:$0xff]  ;;  %v368_v31 = vld [vmem:[#allocation6 + $0x180] sm:$0xff]  ;;  %454 = vmatpush.msra.mxu0 %v338_v26  ;;  %681 = vmatpush.msra.mxu2 %v400_v28  ;;  %v379_v17 = vld [vmem:[#allocation6 + $0x1d8] sm:$0xff] }
  0x1f   :  { %567 = vmatpush.msra.mxu1 %v370_v27  ;;  %v398_v32 = vld [vmem:[#allocation6 + $0x270] sm:$0xff]  ;;  %794 = vmatpush.msra.mxu3 %v432_v29  ;;  %v396_v36 = vld [vmem:[#allocation6 + $0x260] sm:$0xff]  ;;  %v197_v19 = vld [vmem:[#allocation3 + $0x28] sm:$0xff] }
  0x20   :  { %v430_v33 = vld [vmem:[#allocation6 + $0x370] sm:$0xff]  ;;  %455 = vmatpush.msra.mxu0 %v336_v30  ;;  %v428_v37 = vld [vmem:[#allocation6 + $0x360] sm:$0xff]  ;;  %682 = vmatpush.msra.mxu2 %v398_v32  ;;  %v203_v21 = vld [vmem:[#allocation3 + $0x58] sm:$0xff] }
  0x21   :  { %v334_v34 = vld [vmem:[#allocation6 + $0x70] sm:$0xff]  ;;  %568 = vmatpush.msra.mxu1 %v368_v31  ;;  %795 = vmatpush.msra.mxu3 %v430_v33  ;;  %v332_v38 = vld [vmem:[#allocation6 + $0x60] sm:$0xff]  ;;  %v201_v23 = vld [vmem:[#allocation3 + $0x48] sm:$0xff] }
  0x22   :  { %v366_v35 = vld [vmem:[#allocation6 + $0x170] sm:$0xff]  ;;  %v364_v39 = vld [vmem:[#allocation6 + $0x160] sm:$0xff]  ;;  %456 = vmatpush.msra.mxu0 %v334_v34  ;;  %683 = vmatpush.msra.mxu2 %v396_v36  ;;  %v409_v24 = vld [vmem:[#allocation6 + $0x2c8] sm:$0xff] }
  0x23   :  { %569 = vmatpush.msra.mxu1 %v366_v35  ;;  %v394_v40 = vld [vmem:[#allocation6 + $0x250] sm:$0xff]  ;;  %796 = vmatpush.msra.mxu3 %v428_v37  ;;  %v392_v44 = vld [vmem:[#allocation6 + $0x240] sm:$0xff]  ;;  %v441_v25 = vld [vmem:[#allocation6 + $0x3c8] sm:$0xff] }
  0x24   :  { %v426_v41 = vld [vmem:[#allocation6 + $0x350] sm:$0xff]  ;;  %457 = vmatpush.msra.mxu0 %v332_v38  ;;  %v424_v45 = vld [vmem:[#allocation6 + $0x340] sm:$0xff]  ;;  %684 = vmatpush.msra.mxu2 %v394_v40  ;;  %v345_v26 = vld [vmem:[#allocation6 + $0xc8] sm:$0xff] }
  0x25   :  { %v330_v42 = vld [vmem:[#allocation6 + $0x50] sm:$0xff]  ;;  %570 = vmatpush.msra.mxu1 %v364_v39  ;;  %797 = vmatpush.msra.mxu3 %v426_v41  ;;  %v328_v46 = vld [vmem:[#allocation6 + $0x40] sm:$0xff]  ;;  %v377_v27 = vld [vmem:[#allocation6 + $0x1c8] sm:$0xff] }
  0x26   :  { %v362_v43 = vld [vmem:[#allocation6 + $0x150] sm:$0xff]  ;;  %v360_v47 = vld [vmem:[#allocation6 + $0x140] sm:$0xff]  ;;  %458 = vmatpush.msra.mxu0 %v330_v42  ;;  %685 = vmatpush.msra.mxu2 %v392_v44  ;;  %v207_v29 = vld [vmem:[#allocation3 + $0x78] sm:$0xff] }
  0x27   :  { %571 = vmatpush.msra.mxu1 %v362_v43  ;;  %v390_v48 = vld [vmem:[#allocation6 + $0x230] sm:$0xff]  ;;  %798 = vmatpush.msra.mxu3 %v424_v45  ;;  %v388_v52 = vld [vmem:[#allocation6 + $0x220] sm:$0xff]  ;;  %v205_v31 = vld [vmem:[#allocation3 + $0x68] sm:$0xff] }
  0x28   :  { %v422_v49 = vld [vmem:[#allocation6 + $0x330] sm:$0xff]  ;;  %459 = vmatpush.msra.mxu0 %v328_v46  ;;  %v420_v53 = vld [vmem:[#allocation6 + $0x320] sm:$0xff]  ;;  %686 = vmatpush.msra.mxu2 %v390_v48  ;;  %v211_v33 = vld [vmem:[#allocation3 + $0x98] sm:$0xff] }
  0x29   :  { %v326_v50 = vld [vmem:[#allocation6 + $0x30] sm:$0xff]  ;;  %572 = vmatpush.msra.mxu1 %v360_v47  ;;  %799 = vmatpush.msra.mxu3 %v422_v49  ;;  %v324_v54 = vld [vmem:[#allocation6 + $0x20] sm:$0xff]  ;;  %v209_v35 = vld [vmem:[#allocation3 + $0x88] sm:$0xff] }
  0x2a   :  { %v358_v51 = vld [vmem:[#allocation6 + $0x130] sm:$0xff]  ;;  %v356_v55 = vld [vmem:[#allocation6 + $0x120] sm:$0xff]  ;;  %460 = vmatpush.msra.mxu0 %v326_v50  ;;  %687 = vmatpush.msra.mxu2 %v388_v52  ;;  %v407_v36 = vld [vmem:[#allocation6 + $0x2b8] sm:$0xff] }
  0x2b   :  { %573 = vmatpush.msra.mxu1 %v358_v51  ;;  %v386_v56 = vld [vmem:[#allocation6 + $0x210] sm:$0xff]  ;;  %800 = vmatpush.msra.mxu3 %v420_v53  ;;  %v384_v60 = vld [vmem:[#allocation6 + $0x200] sm:$0xff]  ;;  %v439_v37 = vld [vmem:[#allocation6 + $0x3b8] sm:$0xff] }
  0x2c   :  { %v418_v57 = vld [vmem:[#allocation6 + $0x310] sm:$0xff]  ;;  %461 = vmatpush.msra.mxu0 %v324_v54  ;;  %v416_v61 = vld [vmem:[#allocation6 + $0x300] sm:$0xff]  ;;  %688 = vmatpush.msra.mxu2 %v386_v56  ;;  %v343_v38 = vld [vmem:[#allocation6 + $0xb8] sm:$0xff] }
  0x2d   :  { %v322_v58 = vld [vmem:[#allocation6 + $0x10] sm:$0xff]  ;;  %574 = vmatpush.msra.mxu1 %v356_v55  ;;  %801 = vmatpush.msra.mxu3 %v418_v57  ;;  %v320_v2 = vld [vmem:[#allocation6] sm:$0xff]  ;;  %v375_v39 = vld [vmem:[#allocation6 + $0x1b8] sm:$0xff] }
  0x2e   :  { %v354_v59 = vld [vmem:[#allocation6 + $0x110] sm:$0xff]  ;;  %462 = vmatpush.msra.mxu0 %v322_v58  ;;  %689 = vmatpush.msra.mxu2 %v384_v60  ;;  %v352_v3 = vld [vmem:[#allocation6 + $0x100] sm:$0xff]  ;;  %v215_v41 = vld [vmem:[#allocation3 + $0xb8] sm:$0xff] }
  0x2f   :  { %v194_v62 = vld [vmem:[#allocation3 + $0x10] sm:$0xff]  ;;  %575 = vmatpush.msra.mxu1 %v354_v59  ;;  %802 = vmatpush.msra.mxu3 %v416_v61  ;;  %v192_v4 = vld [vmem:[#allocation3] sm:$0xff]  ;;  %v213_v43 = vld [vmem:[#allocation3 + $0xa8] sm:$0xff] }
  0x30   :  { %690 = vmatmul.f32.vlgmr.msra.gmra.mxu2 %v194_v62  ;;  %803 = vmatmul.f32.vlgmr.msra.gmra.mxu3 %v195_v63  ;;  %v198_v14 = vld [vmem:[#allocation3 + $0x30] sm:$0xff]  ;;  %v196_v18 = vld [vmem:[#allocation3 + $0x20] sm:$0xff]  ;;  %v219_v45 = vld [vmem:[#allocation3 + $0xd8] sm:$0xff] }
  0x31   :  { %1126 = vmatpush.msrb.mxu2 %v415_v0  ;;  %1239 = vmatpush.msrb.mxu3 %v447_v1  ;;  %v202_v20 = vld [vmem:[#allocation3 + $0x50] sm:$0xff]  ;;  %v200_v22 = vld [vmem:[#allocation3 + $0x40] sm:$0xff]  ;;  %v217_v47 = vld [vmem:[#allocation3 + $0xc8] sm:$0xff] }
  0x32   :  { %463 = vmatpush.msra.mxu0 %v320_v2  ;;  %576 = vmatpush.msra.mxu1 %v352_v3  ;;  %v206_v28 = vld [vmem:[#allocation3 + $0x70] sm:$0xff]  ;;  %v204_v30 = vld [vmem:[#allocation3 + $0x60] sm:$0xff]  ;;  %v405_v48 = vld [vmem:[#allocation6 + $0x2a8] sm:$0xff] }
  0x33   :  { %464 = vmatmul.f32.vlgmr.msra.gmra.mxu0 %v192_v4  ;;  %577 = vmatmul.f32.vlgmr.msra.gmra.mxu1 %v193_v5  ;;  %v210_v32 = vld [vmem:[#allocation3 + $0x90] sm:$0xff]  ;;  %v208_v34 = vld [vmem:[#allocation3 + $0x80] sm:$0xff]  ;;  %v437_v49 = vld [vmem:[#allocation6 + $0x3a8] sm:$0xff] }
  0x34   :  { %900 = vmatpush.msrb.mxu0 %v351_v6  ;;  %1013 = vmatpush.msrb.mxu1 %v383_v7  ;;  %v214_v40 = vld [vmem:[#allocation3 + $0xb0] sm:$0xff]  ;;  %v212_v42 = vld [vmem:[#allocation3 + $0xa0] sm:$0xff]  ;;  %v341_v50 = vld [vmem:[#allocation6 + $0xa8] sm:$0xff] }
  0x35   :  { %1127 = vmatpush.msrb.mxu2 %v413_v8  ;;  %1240 = vmatpush.msrb.mxu3 %v445_v9  ;;  %v218_v44 = vld [vmem:[#allocation3 + $0xd0] sm:$0xff]  ;;  %v216_v46 = vld [vmem:[#allocation3 + $0xc0] sm:$0xff]  ;;  %v373_v51 = vld [vmem:[#allocation6 + $0x1a8] sm:$0xff] }
  0x36   :  { %901 = vmatpush.msrb.mxu0 %v349_v10  ;;  %1014 = vmatpush.msrb.mxu1 %v381_v11  ;;  %v222_v52 = vld [vmem:[#allocation3 + $0xf0] sm:$0xff]  ;;  %v223_v53 = vld [vmem:[#allocation3 + $0xf8] sm:$0xff]  ;;  %v220_v54 = vld [vmem:[#allocation3 + $0xe0] sm:$0xff] }
  0x37   :  { %1128 = vmatpush.msrb.mxu2 %v411_v12  ;;  %1241 = vmatpush.msrb.mxu3 %v443_v13  ;;  %v221_v55 = vld [vmem:[#allocation3 + $0xe8] sm:$0xff]  ;;  %v226_v56 = vld [vmem:[#allocation3 + $0x110] sm:$0xff]  ;;  %v227_v57 = vld [vmem:[#allocation3 + $0x118] sm:$0xff] }
  0x38   :  { %693 = vmatmul.f32.gmra.mxu2 %v198_v14  ;;  %806 = vmatmul.f32.gmra.mxu3 %v199_v15  ;;  %v224_v58 = vld [vmem:[#allocation3 + $0x100] sm:$0xff]  ;;  %v225_v59 = vld [vmem:[#allocation3 + $0x108] sm:$0xff]  ;;  %v403_v60 = vld [vmem:[#allocation6 + $0x298] sm:$0xff] }
  0x39   :  { %902 = vmatpush.msrb.mxu0 %v347_v16  ;;  %1015 = vmatpush.msrb.mxu1 %v379_v17  ;;  %v435_v61 = vld [vmem:[#allocation6 + $0x398] sm:$0xff]  ;;  %v230_v0 = vld [vmem:[#allocation3 + $0x130] sm:$0xff]  ;;  %v228_v2 = vld [vmem:[#allocation3 + $0x120] sm:$0xff] }
  0x3a   :  { %1129 = vmatpush.msrb.mxu2 %v409_v24  ;;  %1242 = vmatpush.msrb.mxu3 %v441_v25  ;;  %v339_v62 = vld [vmem:[#allocation6 + $0x98] sm:$0xff]  ;;  %v229_v3 = vld [vmem:[#allocation3 + $0x128] sm:$0xff]  ;;  %v234_v4 = vld [vmem:[#allocation3 + $0x150] sm:$0xff] }
  0x3b   :  { %467 = vmatmul.f32.gmra.mxu0 %v196_v18  ;;  %580 = vmatmul.f32.gmra.mxu1 %v197_v19  ;;  %v371_v63 = vld [vmem:[#allocation6 + $0x198] sm:$0xff]  ;;  %v232_v6 = vld [vmem:[#allocation3 + $0x140] sm:$0xff]  ;;  %v233_v7 = vld [vmem:[#allocation3 + $0x148] sm:$0xff] }
  0x3c   :  { %903 = vmatpush.msrb.mxu0 %v345_v26  ;;  %1016 = vmatpush.msrb.mxu1 %v377_v27  ;;  %v231_v1 = vld [vmem:[#allocation3 + $0x138] sm:$0xff]  ;;  %v401_v8 = vld [vmem:[#allocation6 + $0x288] sm:$0xff]  ;;  %v238_v12 = vld [vmem:[#allocation3 + $0x170] sm:$0xff] }
  0x3d   :  { %1130 = vmatpush.msrb.mxu2 %v407_v36  ;;  %1243 = vmatpush.msrb.mxu3 %v439_v37  ;;  %v235_v5 = vld [vmem:[#allocation3 + $0x158] sm:$0xff]  ;;  %v433_v9 = vld [vmem:[#allocation6 + $0x388] sm:$0xff]  ;;  %v236_v14 = vld [vmem:[#allocation3 + $0x160] sm:$0xff] }
  0x3e   :  { %904 = vmatpush.msrb.mxu0 %v343_v38  ;;  %1017 = vmatpush.msrb.mxu1 %v375_v39  ;;  %v337_v10 = vld [vmem:[#allocation6 + $0x88] sm:$0xff]  ;;  %v239_v13 = vld [vmem:[#allocation3 + $0x178] sm:$0xff]  ;;  %v242_v16 = vld [vmem:[#allocation3 + $0x190] sm:$0xff] }
  0x3f   :  { %1131 = vmatpush.msrb.mxu2 %v405_v48  ;;  %1244 = vmatpush.msrb.mxu3 %v437_v49  ;;  %v369_v11 = vld [vmem:[#allocation6 + $0x188] sm:$0xff]  ;;  %v243_v17 = vld [vmem:[#allocation3 + $0x198] sm:$0xff]  ;;  %v240_v18 = vld [vmem:[#allocation3 + $0x180] sm:$0xff] }
  0x40   :  { %696 = vmatmul.f32.gmra.mxu2 %v202_v20  ;;  %809 = vmatmul.f32.gmra.mxu3 %v203_v21  ;;  %v237_v15 = vld [vmem:[#allocation3 + $0x168] sm:$0xff]  ;;  %v399_v20 = vld [vmem:[#allocation6 + $0x278] sm:$0xff]  ;;  %v246_v24 = vld [vmem:[#allocation3 + $0x1b0] sm:$0xff] }
  0x41   :  { %905 = vmatpush.msrb.mxu0 %v341_v50  ;;  %1018 = vmatpush.msrb.mxu1 %v373_v51  ;;  %v241_v19 = vld [vmem:[#allocation3 + $0x188] sm:$0xff]  ;;  %v431_v21 = vld [vmem:[#allocation6 + $0x378] sm:$0xff]  ;;  %v244_v26 = vld [vmem:[#allocation3 + $0x1a0] sm:$0xff] }
  0x42   :  { %1132 = vmatpush.msrb.mxu2 %v403_v60  ;;  %1245 = vmatpush.msrb.mxu3 %v435_v61  ;;  %v247_v25 = vld [vmem:[#allocation3 + $0x1b8] sm:$0xff]  ;;  %v245_v27 = vld [vmem:[#allocation3 + $0x1a8] sm:$0xff]  ;;  %v254_v36 = vld [vmem:[#allocation3 + $0x1f0] sm:$0xff] }
  0x43   :  { %470 = vmatmul.f32.gmra.mxu0 %v200_v22  ;;  %583 = vmatmul.f32.gmra.mxu1 %v201_v23  ;;  %v335_v22 = vld [vmem:[#allocation6 + $0x78] sm:$0xff]  ;;  %v252_v38 = vld [vmem:[#allocation3 + $0x1e0] sm:$0xff]  ;;  %v253_v39 = vld [vmem:[#allocation3 + $0x1e8] sm:$0xff] }
  0x44   :  { %906 = vmatpush.msrb.mxu0 %v339_v62  ;;  %1019 = vmatpush.msrb.mxu1 %v371_v63  ;;  %v367_v23 = vld [vmem:[#allocation6 + $0x178] sm:$0xff]  ;;  %v260_v62 = vld [vmem:[#allocation3 + $0x220] sm:$0xff]  ;;  %v261_v63 = vld [vmem:[#allocation3 + $0x228] sm:$0xff] }
  0x45   :  { %1133 = vmatpush.msrb.mxu2 %v401_v8  ;;  %1246 = vmatpush.msrb.mxu3 %v433_v9  ;;  %v255_v37 = vld [vmem:[#allocation3 + $0x1f8] sm:$0xff] }
  0x46   :  { %907 = vmatpush.msrb.mxu0 %v337_v10  ;;  %1020 = vmatpush.msrb.mxu1 %v369_v11  ;;  %v395_v48 = vld [vmem:[#allocation6 + $0x258] sm:$0xff]  ;;  %v264_v10 = vld [vmem:[#allocation3 + $0x240] sm:$0xff]  ;;  %v265_v11 = vld [vmem:[#allocation3 + $0x248] sm:$0xff] }
  0x47   :  { %1134 = vmatpush.msrb.mxu2 %v399_v20  ;;  %1247 = vmatpush.msrb.mxu3 %v431_v21  ;;  %v427_v49 = vld [vmem:[#allocation6 + $0x358] sm:$0xff]  ;;  %v1932_v20 = vld [vmem:[#allocation3 + $0x270] sm:$0xff] }
  0x48   :  { %699 = vmatmul.f32.gmra.mxu2 %v206_v28  ;;  %812 = vmatmul.f32.gmra.mxu3 %v207_v29  ;;  %v250_v28 = vld [vmem:[#allocation3 + $0x1d0] sm:$0xff]  ;;  %v251_v29 = vld [vmem:[#allocation3 + $0x1d8] sm:$0xff] }
  0x49   :  { %908 = vmatpush.msrb.mxu0 %v335_v22  ;;  %1021 = vmatpush.msrb.mxu1 %v367_v23  ;;  %v1934_v21 = vld [vmem:[#allocation3 + $0x278] sm:$0xff] }
  0x4b   :  { %473 = vmatmul.f32.gmra.mxu0 %v204_v30  ;;  %586 = vmatmul.f32.gmra.mxu1 %v205_v31  ;;  %v248_v30 = vld [vmem:[#allocation3 + $0x1c0] sm:$0xff]  ;;  %v249_v31 = vld [vmem:[#allocation3 + $0x1c8] sm:$0xff] }
  0x50   :  { %702 = vmatmul.f32.gmra.mxu2 %v210_v32  ;;  %815 = vmatmul.f32.gmra.mxu3 %v211_v33  ;;  %v397_v32 = vld [vmem:[#allocation6 + $0x268] sm:$0xff] }
  0x51   :  { %v429_v33 = vld [vmem:[#allocation6 + $0x368] sm:$0xff]  ;;  %1135 = vmatpush.msrb.mxu2 %v397_v32  ;;  %v1945_v32 = vld [vmem:[#allocation3 + $0x290] sm:$0xff] }
  0x52   :  { %1248 = vmatpush.msrb.mxu3 %v429_v33  ;;  %v1947_v33 = vld [vmem:[#allocation3 + $0x298] sm:$0xff] }
  0x53   :  { %476 = vmatmul.f32.gmra.mxu0 %v208_v34  ;;  %589 = vmatmul.f32.gmra.mxu1 %v209_v35  ;;  %v333_v34 = vld [vmem:[#allocation6 + $0x68] sm:$0xff] }
  0x54   :  { %v365_v35 = vld [vmem:[#allocation6 + $0x168] sm:$0xff]  ;;  %909 = vmatpush.msrb.mxu0 %v333_v34  ;;  %1136 = vmatpush.msrb.mxu2 %v395_v48  ;;  %v1958_v48 = vld [vmem:[#allocation3 + $0x2b0] sm:$0xff] }
  0x55   :  { %1022 = vmatpush.msrb.mxu1 %v365_v35  ;;  %1249 = vmatpush.msrb.mxu3 %v427_v49  ;;  %v1960_v49 = vld [vmem:[#allocation3 + $0x2b8] sm:$0xff] }
  0x58   :  { %705 = vmatmul.f32.gmra.mxu2 %v214_v40  ;;  %818 = vmatmul.f32.gmra.mxu3 %v215_v41  ;;  %v258_v40 = vld [vmem:[#allocation3 + $0x210] sm:$0xff]  ;;  %v259_v41 = vld [vmem:[#allocation3 + $0x218] sm:$0xff] }
  0x5b   :  { %479 = vmatmul.f32.gmra.mxu0 %v212_v42  ;;  %592 = vmatmul.f32.gmra.mxu1 %v213_v43 }
  0x60   :  { %708 = vmatmul.f32.gmra.mxu2 %v218_v44  ;;  %821 = vmatmul.f32.gmra.mxu3 %v219_v45  ;;  %v256_v44 = vld [vmem:[#allocation3 + $0x200] sm:$0xff]  ;;  %v257_v45 = vld [vmem:[#allocation3 + $0x208] sm:$0xff] }
  0x63   :  { %482 = vmatmul.f32.gmra.mxu0 %v216_v46  ;;  %595 = vmatmul.f32.gmra.mxu1 %v217_v47  ;;  %v1547_v47 = vld [vmem:[#allocation8] sm:$0x3] }
  0x68   :  { %711 = vmatmul.f32.gmra.mxu2 %v222_v52  ;;  %824 = vmatmul.f32.gmra.mxu3 %v223_v53  ;;  %v1928_v53 = vperm.slane %v1547_v47, 0  ;;  %v359_v47 = vld [vmem:[#allocation6 + $0x138] sm:$0xff] }
  0x6b   :  { %485 = vmatmul.f32.gmra.mxu0 %v220_v54  ;;  %598 = vmatmul.f32.gmra.mxu1 %v221_v55  ;;  %v331_v54 = vld [vmem:[#allocation6 + $0x58] sm:$0xff] }
  0x6c   :  { %v363_v55 = vld [vmem:[#allocation6 + $0x158] sm:$0xff]  ;;  %910 = vmatpush.msrb.mxu0 %v331_v54 }
  0x6d   :  { %1023 = vmatpush.msrb.mxu1 %v363_v55  ;;  %v1965_v55 = vld [vmem:[#allocation3 + $0x2a0] sm:$0xff] }
  0x70   :  { %714 = vmatmul.f32.gmra.mxu2 %v226_v56  ;;  %827 = vmatmul.f32.gmra.mxu3 %v227_v57  ;;  %v262_v56 = vld [vmem:[#allocation3 + $0x230] sm:$0xff]  ;;  %v263_v57 = vld [vmem:[#allocation3 + $0x238] sm:$0xff] }
  0x73   :  { %488 = vmatmul.f32.gmra.mxu0 %v224_v58  ;;  %601 = vmatmul.f32.gmra.mxu1 %v225_v59 }
  0x78   :  { %717 = vmatmul.f32.gmra.mxu2 %v230_v0  ;;  %830 = vmatmul.f32.gmra.mxu3 %v231_v1 }
  0x7b   :  { %491 = vmatmul.f32.gmra.mxu0 %v228_v2  ;;  %604 = vmatmul.f32.gmra.mxu1 %v229_v3 }
  0x80   :  { %720 = vmatmul.f32.gmra.mxu2 %v234_v4  ;;  %833 = vmatmul.f32.gmra.mxu3 %v235_v5  ;;  %v266_v4 = vld [vmem:[#allocation3 + $0x250] sm:$0xff]  ;;  %v267_v5 = vld [vmem:[#allocation3 + $0x258] sm:$0xff] }
  0x83   :  { %494 = vmatmul.f32.gmra.mxu0 %v232_v6  ;;  %607 = vmatmul.f32.gmra.mxu1 %v233_v7 }
  0x88   :  { %723 = vmatmul.f32.gmra.mxu2 %v238_v12  ;;  %836 = vmatmul.f32.gmra.mxu3 %v239_v13  ;;  %v393_v13 = vld [vmem:[#allocation6 + $0x248] sm:$0xff] }
  0x89   :  { %1137 = vmatpush.msrb.mxu2 %v393_v13  ;;  %v1984_v13 = vld [vmem:[#allocation3 + $0x2f0] sm:$0xff] }
  0x8b   :  { %497 = vmatmul.f32.gmra.mxu0 %v236_v14  ;;  %610 = vmatmul.f32.gmra.mxu1 %v237_v15  ;;  %v425_v14 = vld [vmem:[#allocation6 + $0x348] sm:$0xff] }
  0x8c   :  { %1250 = vmatpush.msrb.mxu3 %v425_v14  ;;  %v1986_v14 = vld [vmem:[#allocation3 + $0x2f8] sm:$0xff] }
  0x90   :  { %726 = vmatmul.f32.gmra.mxu2 %v242_v16  ;;  %839 = vmatmul.f32.gmra.mxu3 %v243_v17 }
  0x93   :  { %500 = vmatmul.f32.gmra.mxu0 %v240_v18  ;;  %613 = vmatmul.f32.gmra.mxu1 %v241_v19  ;;  %v329_v18 = vld [vmem:[#allocation6 + $0x48] sm:$0xff] }
  0x94   :  { %v361_v19 = vld [vmem:[#allocation6 + $0x148] sm:$0xff]  ;;  %911 = vmatpush.msrb.mxu0 %v329_v18 }
  0x95   :  { %1024 = vmatpush.msrb.mxu1 %v361_v19  ;;  %v1991_v19 = vld [vmem:[#allocation3 + $0x2e0] sm:$0xff] }
  0x97   :  { %1025 = vmatpush.msrb.mxu1 %v359_v47  ;;  %v323_v47 = vld [vmem:[#allocation6 + $0x18] sm:$0xff] }
  0x98   :  { %729 = vmatmul.f32.gmra.mxu2 %v246_v24  ;;  %842 = vmatmul.f32.gmra.mxu3 %v247_v25 }
  0x9b   :  { %503 = vmatmul.f32.gmra.mxu0 %v244_v26  ;;  %616 = vmatmul.f32.gmra.mxu1 %v245_v27  ;;  %v1939_v26 = vld [vmem:[#allocation3 + $0x260] sm:$0xff]  ;;  %v1941_v27 = vld [vmem:[#allocation3 + $0x268] sm:$0xff] }
  0xa0   :  { %732 = vmatmul.f32.gmra.mxu2 %v250_v28  ;;  %845 = vmatmul.f32.gmra.mxu3 %v251_v29 }
  0xa3   :  { %506 = vmatmul.f32.gmra.mxu0 %v248_v30  ;;  %619 = vmatmul.f32.gmra.mxu1 %v249_v31 }
  0xa8   :  { %735 = vmatmul.f32.gmra.mxu2 %v254_v36  ;;  %848 = vmatmul.f32.gmra.mxu3 %v255_v37 }
  0xab   :  { %509 = vmatmul.f32.gmra.mxu0 %v252_v38  ;;  %622 = vmatmul.f32.gmra.mxu1 %v253_v39  ;;  %v1952_v38 = vld [vmem:[#allocation3 + $0x280] sm:$0xff]  ;;  %v1954_v39 = vld [vmem:[#allocation3 + $0x288] sm:$0xff] }
  0xb0   :  { %738 = vmatmul.f32.gmra.mxu2 %v258_v40  ;;  %v465_v42 = vpop.f32.mrf.mxu0  ;;  %v578_v43 = vpop.f32.mrf.mxu1  ;;  %851 = vmatmul.f32.gmra.mxu3 %v259_v41  ;;  %v391_v41 = vld [vmem:[#allocation6 + $0x238] sm:$0xff] }
  0xb1   :  { %v579_v46 = vadd.f32 %v578_v43, %v465_v42  ;;  %v423_v42 = vld [vmem:[#allocation6 + $0x338] sm:$0xff]  ;;  %1138 = vmatpush.msrb.mxu2 %v391_v41 }
  0xb2   :  { %1251 = vmatpush.msrb.mxu3 %v423_v42  ;;  %v387_v42 = vld [vmem:[#allocation6 + $0x218] sm:$0xff] }
  0xb3   :  { %v691_v50 = vpop.f32.mrf.mxu2  ;;  %512 = vmatmul.f32.gmra.mxu0 %v256_v44  ;;  %625 = vmatmul.f32.gmra.mxu1 %v257_v45  ;;  %v804_v51 = vpop.f32.mrf.mxu3 }
  0xb4   :  { %v692_v52 = vadd.f32 %v691_v50, %v579_v46  ;;  %v327_v46 = vld [vmem:[#allocation6 + $0x38] sm:$0xff] }
  0xb5   :  { %912 = vmatpush.msrb.mxu0 %v327_v46 }
  0xb6   :  { %v805_v58 = vadd.f32 %v804_v51, %v692_v52 }
  0xb8   :  { %v1553_v59 = vadd.f32 %v1928_v53, %v805_v58  ;;  %741 = vmatmul.f32.gmra.mxu2 %v262_v56  ;;  %v468_v60 = vpop.f32.mrf.mxu0  ;;  %v581_v61 = vpop.f32.mrf.mxu1  ;;  %854 = vmatmul.f32.gmra.mxu3 %v263_v57  ;;  %v1967_v56 = vld [vmem:[#allocation3 + $0x2a8] sm:$0xff] }
  0xb9   :  { %v582_v0 = vadd.f32 %v581_v61, %v468_v60  ;;  %v1971_v61 = vld [vmem:[#allocation3 + $0x2d0] sm:$0xff] }
  0xba   :  { %1617 = vst [vmem:[#allocation9] sm:$0xff] %v1553_v59 }
  0xbb   :  { %v694_v1 = vpop.f32.mrf.mxu2  ;;  %515 = vmatmul.f32.gmra.mxu0 %v260_v62  ;;  %628 = vmatmul.f32.gmra.mxu1 %v261_v63  ;;  %v807_v2 = vpop.f32.mrf.mxu3  ;;  %v1973_v62 = vld [vmem:[#allocation3 + $0x2d8] sm:$0xff] }
  0xbc   :  { %v695_v3 = vadd.f32 %v694_v1, %v582_v0 }
  0xbe   :  { %v808_v6 = vadd.f32 %v807_v2, %v695_v3  ;;  %v1978_v3 = vld [vmem:[#allocation3 + $0x2c0] sm:$0xff] }
  0xc0   :  { %v1555_v7 = vadd.f32 %v1928_v53, %v808_v6  ;;  %744 = vmatmul.f32.gmra.mxu2 %v266_v4  ;;  %v471_v8 = vpop.f32.mrf.mxu0  ;;  %v584_v9 = vpop.f32.mrf.mxu1  ;;  %857 = vmatmul.f32.gmra.mxu3 %v267_v5  ;;  %v1980_v4 = vld [vmem:[#allocation3 + $0x2c8] sm:$0xff] }
  0xc1   :  { %v585_v12 = vadd.f32 %v584_v9, %v471_v8  ;;  %v389_v6 = vld [vmem:[#allocation6 + $0x228] sm:$0xff] }
  0xc2   :  { %1619 = vst [vmem:[#allocation9 + $0x10] sm:$0xff] %v1555_v7  ;;  %v421_v7 = vld [vmem:[#allocation6 + $0x328] sm:$0xff]  ;;  %1139 = vmatpush.msrb.mxu2 %v389_v6  ;;  %v2023_v6 = vld [vmem:[#allocation3 + $0x350] sm:$0xff] }
  0xc3   :  { %v697_v15 = vpop.f32.mrf.mxu2  ;;  %518 = vmatmul.f32.gmra.mxu0 %v264_v10  ;;  %631 = vmatmul.f32.gmra.mxu1 %v265_v11  ;;  %v810_v16 = vpop.f32.mrf.mxu3  ;;  %v325_v11 = vld [vmem:[#allocation6 + $0x28] sm:$0xff] }
  0xc4   :  { %v698_v17 = vadd.f32 %v697_v15, %v585_v12  ;;  %1252 = vmatpush.msrb.mxu3 %v421_v7  ;;  %v357_v12 = vld [vmem:[#allocation6 + $0x128] sm:$0xff]  ;;  %913 = vmatpush.msrb.mxu0 %v325_v11  ;;  %v2025_v7 = vld [vmem:[#allocation3 + $0x358] sm:$0xff] }
  0xc5   :  { %1026 = vmatpush.msrb.mxu1 %v357_v12  ;;  %1140 = vmatpush.msrb.mxu2 %v387_v42  ;;  %v2030_v12 = vld [vmem:[#allocation3 + $0x340] sm:$0xff] }
  0xc6   :  { %v811_v22 = vadd.f32 %v810_v16, %v698_v17  ;;  %914 = vmatpush.msrb.mxu0 %v323_v47 }
  0xc8   :  { %v1557_v23 = vadd.f32 %v1928_v53, %v811_v22  ;;  %747 = vmatmul.f32.gmra.mxu2 %v1932_v20  ;;  %v474_v24 = vpop.f32.mrf.mxu0  ;;  %v587_v25 = vpop.f32.mrf.mxu1  ;;  %860 = vmatmul.f32.gmra.mxu3 %v1934_v21  ;;  %v1993_v22 = vld [vmem:[#allocation3 + $0x2e8] sm:$0xff] }
  0xc9   :  { %v588_v28 = vadd.f32 %v587_v25, %v474_v24 }
  0xca   :  { %1621 = vst [vmem:[#allocation9 + $0x20] sm:$0xff] %v1557_v23 }
  0xcb   :  { %v700_v29 = vpop.f32.mrf.mxu2  ;;  %521 = vmatmul.f32.gmra.mxu0 %v1939_v26  ;;  %634 = vmatmul.f32.gmra.mxu1 %v1941_v27  ;;  %v813_v30 = vpop.f32.mrf.mxu3 }
  0xcc   :  { %v701_v31 = vadd.f32 %v700_v29, %v588_v28  ;;  %v1997_v29 = vld [vmem:[#allocation3 + $0x310] sm:$0xff] }
  0xce   :  { %v814_v34 = vadd.f32 %v813_v30, %v701_v31  ;;  %v1999_v30 = vld [vmem:[#allocation3 + $0x318] sm:$0xff] }
  0xd0   :  { %v1559_v35 = vadd.f32 %v1928_v53, %v814_v34  ;;  %750 = vmatmul.f32.gmra.mxu2 %v1945_v32  ;;  %v477_v36 = vpop.f32.mrf.mxu0  ;;  %v590_v37 = vpop.f32.mrf.mxu1  ;;  %863 = vmatmul.f32.gmra.mxu3 %v1947_v33 }
  0xd1   :  { %v591_v40 = vadd.f32 %v590_v37, %v477_v36  ;;  %v2004_v37 = vld [vmem:[#allocation3 + $0x300] sm:$0xff] }
  0xd2   :  { %1623 = vst [vmem:[#allocation9 + $0x30] sm:$0xff] %v1559_v35 }
  0xd3   :  { %v703_v43 = vpop.f32.mrf.mxu2  ;;  %524 = vmatmul.f32.gmra.mxu0 %v1952_v38  ;;  %637 = vmatmul.f32.gmra.mxu1 %v1954_v39  ;;  %v816_v44 = vpop.f32.mrf.mxu3 }
  0xd4   :  { %v704_v45 = vadd.f32 %v703_v43, %v591_v40  ;;  %v2006_v40 = vld [vmem:[#allocation3 + $0x308] sm:$0xff]  ;;  %v419_v43 = vld [vmem:[#allocation6 + $0x318] sm:$0xff] }
  0xd5   :  { %1253 = vmatpush.msrb.mxu3 %v419_v43 }
  0xd6   :  { %v817_v50 = vadd.f32 %v816_v44, %v704_v45 }
  0xd8   :  { %v1561_v51 = vadd.f32 %v1928_v53, %v817_v50  ;;  %753 = vmatmul.f32.gmra.mxu2 %v1958_v48  ;;  %v480_v52 = vpop.f32.mrf.mxu0  ;;  %v593_v54 = vpop.f32.mrf.mxu1  ;;  %866 = vmatmul.f32.gmra.mxu3 %v1960_v49  ;;  %v355_v50 = vld [vmem:[#allocation6 + $0x118] sm:$0xff] }
  0xd9   :  { %v594_v57 = vadd.f32 %v593_v54, %v480_v52  ;;  %v2012_v52 = vld [vmem:[#allocation3 + $0x338] sm:$0xff]  ;;  %1027 = vmatpush.msrb.mxu1 %v355_v50 }
  0xda   :  { %1625 = vst [vmem:[#allocation9 + $0x40] sm:$0xff] %v1561_v51  ;;  %v2010_v51 = vld [vmem:[#allocation3 + $0x330] sm:$0xff] }
  0xdb   :  { %v706_v58 = vpop.f32.mrf.mxu2  ;;  %527 = vmatmul.f32.gmra.mxu0 %v1965_v55  ;;  %640 = vmatmul.f32.gmra.mxu1 %v1967_v56  ;;  %v819_v59 = vpop.f32.mrf.mxu3 }
  0xdc   :  { %v707_v60 = vadd.f32 %v706_v58, %v594_v57 }
  0xde   :  { %v820_v63 = vadd.f32 %v819_v59, %v707_v60  ;;  %v2017_v60 = vld [vmem:[#allocation3 + $0x320] sm:$0xff] }
  0xe0   :  { %v1563_v0 = vadd.f32 %v1928_v53, %v820_v63  ;;  %756 = vmatmul.f32.gmra.mxu2 %v1971_v61  ;;  %v483_v1 = vpop.f32.mrf.mxu0  ;;  %v596_v2 = vpop.f32.mrf.mxu1  ;;  %869 = vmatmul.f32.gmra.mxu3 %v1973_v62  ;;  %v2019_v63 = vld [vmem:[#allocation3 + $0x328] sm:$0xff] }
  0xe1   :  { %v597_v5 = vadd.f32 %v596_v2, %v483_v1 }
  0xe2   :  { %1627 = vst [vmem:[#allocation9 + $0x50] sm:$0xff] %v1563_v0 }
  0xe3   :  { %v709_v8 = vpop.f32.mrf.mxu2  ;;  %530 = vmatmul.f32.gmra.mxu0 %v1978_v3  ;;  %643 = vmatmul.f32.gmra.mxu1 %v1980_v4  ;;  %v822_v9 = vpop.f32.mrf.mxu3 }
  0xe4   :  { %v710_v10 = vadd.f32 %v709_v8, %v597_v5 }
  0xe6   :  { %v823_v15 = vadd.f32 %v822_v9, %v710_v10 }
  0xe8   :  { %v1565_v16 = vadd.f32 %v1928_v53, %v823_v15  ;;  %759 = vmatmul.f32.gmra.mxu2 %v1984_v13  ;;  %v486_v17 = vpop.f32.mrf.mxu0  ;;  %v599_v18 = vpop.f32.mrf.mxu1  ;;  %872 = vmatmul.f32.gmra.mxu3 %v1986_v14  ;;  %v2032_v15 = vld [vmem:[#allocation3 + $0x348] sm:$0xff] }
  0xe9   :  { %v600_v23 = vadd.f32 %v599_v18, %v486_v17  ;;  %v385_v17 = vld [vmem:[#allocation6 + $0x208] sm:$0xff] }
  0xea   :  { %1629 = vst [vmem:[#allocation9 + $0x60] sm:$0xff] %v1565_v16  ;;  %v417_v18 = vld [vmem:[#allocation6 + $0x308] sm:$0xff]  ;;  %1141 = vmatpush.msrb.mxu2 %v385_v17  ;;  %v2062_v17 = vld [vmem:[#allocation3 + $0x3b0] sm:$0xff] }
  0xeb   :  { %v712_v24 = vpop.f32.mrf.mxu2  ;;  %533 = vmatmul.f32.gmra.mxu0 %v1991_v19  ;;  %646 = vmatmul.f32.gmra.mxu1 %v1993_v22  ;;  %v825_v25 = vpop.f32.mrf.mxu3 }
  0xec   :  { %v713_v28 = vadd.f32 %v712_v24, %v600_v23  ;;  %1254 = vmatpush.msrb.mxu3 %v417_v18  ;;  %v2064_v18 = vld [vmem:[#allocation3 + $0x3b8] sm:$0xff] }
  0xee   :  { %v826_v31 = vadd.f32 %v825_v25, %v713_v28  ;;  %v321_v28 = vld [vmem:[#allocation6 + $0x8] sm:$0xff] }
  0xef   :  { %915 = vmatpush.msrb.mxu0 %v321_v28 }
  0xf0   :  { %v1567_v34 = vadd.f32 %v1928_v53, %v826_v31  ;;  %762 = vmatmul.f32.gmra.mxu2 %v1997_v29  ;;  %v489_v35 = vpop.f32.mrf.mxu0  ;;  %v602_v36 = vpop.f32.mrf.mxu1  ;;  %875 = vmatmul.f32.gmra.mxu3 %v1999_v30  ;;  %v353_v31 = vld [vmem:[#allocation6 + $0x108] sm:$0xff] }
  0xf1   :  { %v603_v41 = vadd.f32 %v602_v36, %v489_v35  ;;  %v2038_v35 = vld [vmem:[#allocation3 + $0x378] sm:$0xff]  ;;  %1028 = vmatpush.msrb.mxu1 %v353_v31  ;;  %v2069_v31 = vld [vmem:[#allocation3 + $0x3a0] sm:$0xff] }
  0xf2   :  { %1631 = vst [vmem:[#allocation9 + $0x70] sm:$0xff] %v1567_v34  ;;  %v2036_v34 = vld [vmem:[#allocation3 + $0x370] sm:$0xff] }
  0xf3   :  { %v715_v44 = vpop.f32.mrf.mxu2  ;;  %536 = vmatmul.f32.gmra.mxu0 %v2004_v37  ;;  %649 = vmatmul.f32.gmra.mxu1 %v2006_v40  ;;  %v828_v45 = vpop.f32.mrf.mxu3 }
  0xf4   :  { %v716_v46 = vadd.f32 %v715_v44, %v603_v41  ;;  %v2043_v44 = vld [vmem:[#allocation3 + $0x360] sm:$0xff] }
  0xf6   :  { %v829_v54 = vadd.f32 %v828_v45, %v716_v46  ;;  %v2045_v45 = vld [vmem:[#allocation3 + $0x368] sm:$0xff] }
  0xf8   :  { %v1569_v57 = vadd.f32 %v1928_v53, %v829_v54  ;;  %765 = vmatmul.f32.gmra.mxu2 %v2010_v51  ;;  %v492_v58 = vpop.f32.mrf.mxu0  ;;  %v605_v59 = vpop.f32.mrf.mxu1  ;;  %878 = vmatmul.f32.gmra.mxu3 %v2012_v52 }
  0xf9   :  { %v606_v0 = vadd.f32 %v605_v59, %v492_v58  ;;  %v2051_v58 = vld [vmem:[#allocation3 + $0x398] sm:$0xff] }
  0xfa   :  { %1633 = vst [vmem:[#allocation9 + $0x80] sm:$0xff] %v1569_v57  ;;  %v2049_v57 = vld [vmem:[#allocation3 + $0x390] sm:$0xff] }
  0xfb   :  { %v718_v1 = vpop.f32.mrf.mxu2  ;;  %539 = vmatmul.f32.gmra.mxu0 %v2017_v60  ;;  %652 = vmatmul.f32.gmra.mxu1 %v2019_v63  ;;  %v831_v2 = vpop.f32.mrf.mxu3 }
  0xfc   :  { %v719_v5 = vadd.f32 %v718_v1, %v606_v0 }
  0xfe   :  { %v832_v8 = vadd.f32 %v831_v2, %v719_v5  ;;  %v2056_v5 = vld [vmem:[#allocation3 + $0x380] sm:$0xff] }
 0x100   :  { %v1571_v9 = vadd.f32 %v1928_v53, %v832_v8  ;;  %768 = vmatmul.f32.gmra.mxu2 %v2023_v6  ;;  %v495_v10 = vpop.f32.mrf.mxu0  ;;  %v608_v11 = vpop.f32.mrf.mxu1  ;;  %881 = vmatmul.f32.gmra.mxu3 %v2025_v7  ;;  %v2058_v8 = vld [vmem:[#allocation3 + $0x388] sm:$0xff] }
 0x101   :  { %v609_v16 = vadd.f32 %v608_v11, %v495_v10 }
 0x102   :  { %1635 = vst [vmem:[#allocation9 + $0x90] sm:$0xff] %v1571_v9 }
 0x103   :  { %v721_v23 = vpop.f32.mrf.mxu2  ;;  %542 = vmatmul.f32.gmra.mxu0 %v2030_v12  ;;  %655 = vmatmul.f32.gmra.mxu1 %v2032_v15  ;;  %v834_v24 = vpop.f32.mrf.mxu3 }
 0x104   :  { %v722_v25 = vadd.f32 %v721_v23, %v609_v16 }
 0x106   :  { %v835_v36 = vadd.f32 %v834_v24, %v722_v25 }
 0x108   :  { %v1573_v41 = vadd.f32 %v1928_v53, %v835_v36  ;;  %771 = vmatmul.f32.gmra.mxu2 %v2036_v34  ;;  %v498_v42 = vpop.f32.mrf.mxu0  ;;  %v611_v43 = vpop.f32.mrf.mxu1  ;;  %884 = vmatmul.f32.gmra.mxu3 %v2038_v35  ;;  %v2071_v36 = vld [vmem:[#allocation3 + $0x3a8] sm:$0xff] }
 0x109   :  { %v612_v46 = vadd.f32 %v611_v43, %v498_v42 }
 0x10a   :  { %1637 = vst [vmem:[#allocation9 + $0xa0] sm:$0xff] %v1573_v41 }
 0x10b   :  { %v724_v47 = vpop.f32.mrf.mxu2  ;;  %545 = vmatmul.f32.gmra.mxu0 %v2043_v44  ;;  %658 = vmatmul.f32.gmra.mxu1 %v2045_v45  ;;  %v837_v50 = vpop.f32.mrf.mxu3 }
 0x10c   :  { %v725_v54 = vadd.f32 %v724_v47, %v612_v46  ;;  %v2075_v47 = vld [vmem:[#allocation3 + $0x3d0] sm:$0xff] }
 0x10e   :  { %v838_v59 = vadd.f32 %v837_v50, %v725_v54  ;;  %v2077_v50 = vld [vmem:[#allocation3 + $0x3d8] sm:$0xff] }
 0x110   :  { %v1575_v0 = vadd.f32 %v1928_v53, %v838_v59  ;;  %774 = vmatmul.f32.gmra.mxu2 %v2049_v57  ;;  %v501_v1 = vpop.f32.mrf.mxu0  ;;  %v614_v2 = vpop.f32.mrf.mxu1  ;;  %887 = vmatmul.f32.gmra.mxu3 %v2051_v58 }
 0x111   :  { %v615_v9 = vadd.f32 %v614_v2, %v501_v1  ;;  %v2082_v2 = vld [vmem:[#allocation3 + $0x3c0] sm:$0xff] }
 0x112   :  { %1639 = vst [vmem:[#allocation9 + $0xb0] sm:$0xff] %v1575_v0 }
 0x113   :  { %v727_v10 = vpop.f32.mrf.mxu2  ;;  %548 = vmatmul.f32.gmra.mxu0 %v2056_v5  ;;  %661 = vmatmul.f32.gmra.mxu1 %v2058_v8  ;;  %v840_v11 = vpop.f32.mrf.mxu3  ;;  %2220 = vst [vmem:[#allocation13_spill] sm:$0xff] %v2082_v2 }
 0x114   :  { %v728_v16 = vadd.f32 %v727_v10, %v615_v9  ;;  %v2084_v9 = vld [vmem:[#allocation3 + $0x3c8] sm:$0xff] }
 0x115   :  { %2221 = vst [vmem:[#allocation14_spill] sm:$0xff] %v2084_v9 }
 0x116   :  { %v841_v23 = vadd.f32 %v840_v11, %v728_v16 }
 0x118   :  { %v1577_v24 = vadd.f32 %v1928_v53, %v841_v23  ;;  %777 = vmatmul.f32.gmra.mxu2 %v2062_v17  ;;  %v504_v25 = vpop.f32.mrf.mxu0  ;;  %v617_v28 = vpop.f32.mrf.mxu1  ;;  %890 = vmatmul.f32.gmra.mxu3 %v2064_v18 }
 0x119   :  { %v618_v41 = vadd.f32 %v617_v28, %v504_v25  ;;  %v2090_v25 = vld [vmem:[#allocation3 + $0x3f8] sm:$0xff] }
 0x11a   :  { %1641 = vst [vmem:[#allocation9 + $0xc0] sm:$0xff] %v1577_v24  ;;  %v2088_v24 = vld [vmem:[#allocation3 + $0x3f0] sm:$0xff] }
 0x11b   :  { %v730_v42 = vpop.f32.mrf.mxu2  ;;  %551 = vmatmul.f32.gmra.mxu0 %v2069_v31  ;;  %664 = vmatmul.f32.gmra.mxu1 %v2071_v36  ;;  %v843_v43 = vpop.f32.mrf.mxu3  ;;  %2222 = vst [vmem:[#allocation15_spill] sm:$0xff] %v2088_v24 }
 0x11c   :  { %v731_v46 = vadd.f32 %v730_v42, %v618_v41  ;;  %2223 = vst [vmem:[#allocation16_spill] sm:$0xff] %v2090_v25 }
 0x11e   :  { %v844_v54 = vadd.f32 %v843_v43, %v731_v46  ;;  %v2095_v46 = vld [vmem:[#allocation3 + $0x3e0] sm:$0xff] }
 0x11f   :  { %2224 = vst [vmem:[#allocation17_spill] sm:$0xff] %v2095_v46 }
 0x120   :  { %v1579_v59 = vadd.f32 %v1928_v53, %v844_v54  ;;  %780 = vmatmul.f32.gmra.mxu2 %v2075_v47  ;;  %v507_v0 = vpop.f32.mrf.mxu0  ;;  %v620_v1 = vpop.f32.mrf.mxu1  ;;  %893 = vmatmul.f32.gmra.mxu3 %v2077_v50  ;;  %v2097_v54 = vld [vmem:[#allocation3 + $0x3e8] sm:$0xff] }
 0x121   :  { %v621_v10 = vadd.f32 %v620_v1, %v507_v0  ;;  %2225 = vst [vmem:[#allocation18_spill] sm:$0xff] %v2097_v54 }
 0x122   :  { %1643 = vst [vmem:[#allocation9 + $0xd0] sm:$0xff] %v1579_v59 }
 0x123   :  { %v733_v11 = vpop.f32.mrf.mxu2  ;;  %554 = vmatmul.f32.gmra.mxu0 %v2082_v2  ;;  %667 = vmatmul.f32.gmra.mxu1 %v2084_v9  ;;  %v846_v16 = vpop.f32.mrf.mxu3 }
 0x124   :  { %v734_v23 = vadd.f32 %v733_v11, %v621_v10 }
 0x126   :  { %v847_v28 = vadd.f32 %v846_v16, %v734_v23  ;;  %v1709_v23 = vld [vmem:[#allocation3 + $0x10] sm:$0xff] }
 0x128   :  { %v1581_v41 = vadd.f32 %v1928_v53, %v847_v28  ;;  %783 = vmatmul.f32.gmra.mxu2 %v2088_v24  ;;  %v510_v42 = vpop.f32.mrf.mxu0  ;;  %v623_v43 = vpop.f32.mrf.mxu1  ;;  %896 = vmatmul.f32.gmra.mxu3 %v2090_v25  ;;  %v1710_v24 = vld [vmem:[#allocation3 + $0x18] sm:$0xff] }
 0x129   :  { %v624_v59 = vadd.f32 %v623_v43, %v510_v42  ;;  %v1712_v43 = vld [vmem:[#allocation3 + $0x8] sm:$0xff] }
 0x12a   :  { %1645 = vst [vmem:[#allocation9 + $0xe0] sm:$0xff] %v1581_v41  ;;  %v1711_v41 = vld [vmem:[#allocation3] sm:$0xff] }
 0x12b   :  { %v736_v0 = vpop.f32.mrf.mxu2  ;;  %557 = vmatmul.f32.gmra.mxu0 %v2095_v46  ;;  %670 = vmatmul.f32.gmra.mxu1 %v2097_v54  ;;  %v849_v1 = vpop.f32.mrf.mxu3 }
 0x12c   :  { %v737_v10 = vadd.f32 %v736_v0, %v624_v59  ;;  %v1713_v0 = vld [vmem:[#allocation3 + $0x30] sm:$0xff] }
 0x12e   :  { %v850_v11 = vadd.f32 %v849_v1, %v737_v10 }
 0x130   :  { %v1583_v16 = vadd.f32 %v1928_v53, %v850_v11  ;;  %1142 = vmatmul.f32.vlgmr.msrb.gmra.mxu2 %v1709_v23  ;;  %v513_v28 = vpop.f32.mrf.mxu0  ;;  %v626_v25 = vpop.f32.mrf.mxu1  ;;  %1255 = vmatmul.f32.vlgmr.msrb.gmra.mxu3 %v1710_v24  ;;  %v1714_v11 = vld [vmem:[#allocation3 + $0x38] sm:$0xff] }
 0x131   :  { %v627_v9 = vadd.f32 %v626_v25, %v513_v28  ;;  %v1715_v25 = vld [vmem:[#allocation3 + $0x20] sm:$0xff] }
 0x132   :  { %1647 = vst [vmem:[#allocation9 + $0xf0] sm:$0xff] %v1583_v16  ;;  %v1716_v16 = vld [vmem:[#allocation3 + $0x28] sm:$0xff] }
 0x133   :  { %v739_v42 = vpop.f32.mrf.mxu2  ;;  %916 = vmatmul.f32.vlgmr.msrb.gmra.mxu0 %v1711_v41  ;;  %1029 = vmatmul.f32.vlgmr.msrb.gmra.mxu1 %v1712_v43  ;;  %v852_v46 = vpop.f32.mrf.mxu3 }
 0x134   :  { %v740_v54 = vadd.f32 %v739_v42, %v627_v9  ;;  %v1718_v42 = vld [vmem:[#allocation3 + $0x58] sm:$0xff] }
 0x136   :  { %v853_v2 = vadd.f32 %v852_v46, %v740_v54  ;;  %v1717_v46 = vld [vmem:[#allocation3 + $0x50] sm:$0xff] }
 0x138   :  { %v1585_v59 = vadd.f32 %v1928_v53, %v853_v2  ;;  %1145 = vmatmul.f32.gmra.mxu2 %v1713_v0  ;;  %v516_v1 = vpop.f32.mrf.mxu0  ;;  %v629_v10 = vpop.f32.mrf.mxu1  ;;  %1258 = vmatmul.f32.gmra.mxu3 %v1714_v11 }
 0x139   :  { %v630_v23 = vadd.f32 %v629_v10, %v516_v1  ;;  %v1720_v10 = vld [vmem:[#allocation3 + $0x48] sm:$0xff] }
 0x13a   :  { %1649 = vst [vmem:[#allocation9 + $0x100] sm:$0xff] %v1585_v59  ;;  %v1719_v59 = vld [vmem:[#allocation3 + $0x40] sm:$0xff] }
 0x13b   :  { %v742_v24 = vpop.f32.mrf.mxu2  ;;  %919 = vmatmul.f32.gmra.mxu0 %v1715_v25  ;;  %1032 = vmatmul.f32.gmra.mxu1 %v1716_v16  ;;  %v855_v28 = vpop.f32.mrf.mxu3 }
 0x13c   :  { %v743_v41 = vadd.f32 %v742_v24, %v630_v23  ;;  %v1721_v24 = vld [vmem:[#allocation3 + $0x70] sm:$0xff] }
 0x13e   :  { %v856_v43 = vadd.f32 %v855_v28, %v743_v41 }
 0x140   :  { %v1587_v9 = vadd.f32 %v1928_v53, %v856_v43  ;;  %1148 = vmatmul.f32.gmra.mxu2 %v1717_v46  ;;  %v519_v2 = vpop.f32.mrf.mxu0  ;;  %v632_v54 = vpop.f32.mrf.mxu1  ;;  %1261 = vmatmul.f32.gmra.mxu3 %v1718_v42  ;;  %v1722_v43 = vld [vmem:[#allocation3 + $0x78] sm:$0xff] }
 0x141   :  { %v633_v0 = vadd.f32 %v632_v54, %v519_v2  ;;  %v1724_v54 = vld [vmem:[#allocation3 + $0x68] sm:$0xff] }
 0x142   :  { %1651 = vst [vmem:[#allocation9 + $0x110] sm:$0xff] %v1587_v9  ;;  %v1723_v9 = vld [vmem:[#allocation3 + $0x60] sm:$0xff] }
 0x143   :  { %v745_v1 = vpop.f32.mrf.mxu2  ;;  %922 = vmatmul.f32.gmra.mxu0 %v1719_v59  ;;  %1035 = vmatmul.f32.gmra.mxu1 %v1720_v10  ;;  %v858_v11 = vpop.f32.mrf.mxu3 }
 0x144   :  { %v746_v25 = vadd.f32 %v745_v1, %v633_v0  ;;  %v1725_v1 = vld [vmem:[#allocation3 + $0x90] sm:$0xff] }
 0x146   :  { %v859_v16 = vadd.f32 %v858_v11, %v746_v25 }
 0x148   :  { %v1589_v23 = vadd.f32 %v1928_v53, %v859_v16  ;;  %1151 = vmatmul.f32.gmra.mxu2 %v1721_v24  ;;  %v522_v28 = vpop.f32.mrf.mxu0  ;;  %v635_v41 = vpop.f32.mrf.mxu1  ;;  %1264 = vmatmul.f32.gmra.mxu3 %v1722_v43  ;;  %v1726_v16 = vld [vmem:[#allocation3 + $0x98] sm:$0xff] }
 0x149   :  { %v636_v46 = vadd.f32 %v635_v41, %v522_v28  ;;  %v1728_v41 = vld [vmem:[#allocation3 + $0x88] sm:$0xff] }
 0x14a   :  { %1653 = vst [vmem:[#allocation9 + $0x120] sm:$0xff] %v1589_v23  ;;  %v1727_v23 = vld [vmem:[#allocation3 + $0x80] sm:$0xff] }
 0x14b   :  { %v748_v2 = vpop.f32.mrf.mxu2  ;;  %925 = vmatmul.f32.gmra.mxu0 %v1723_v9  ;;  %1038 = vmatmul.f32.gmra.mxu1 %v1724_v54  ;;  %v861_v42 = vpop.f32.mrf.mxu3 }
 0x14c   :  { %v749_v59 = vadd.f32 %v748_v2, %v636_v46  ;;  %v1729_v2 = vld [vmem:[#allocation3 + $0xb0] sm:$0xff] }
 0x14e   :  { %v862_v10 = vadd.f32 %v861_v42, %v749_v59 }
 0x150   :  { %v1591_v0 = vadd.f32 %v1928_v53, %v862_v10  ;;  %1154 = vmatmul.f32.gmra.mxu2 %v1725_v1  ;;  %v525_v11 = vpop.f32.mrf.mxu0  ;;  %v638_v25 = vpop.f32.mrf.mxu1  ;;  %1267 = vmatmul.f32.gmra.mxu3 %v1726_v16  ;;  %v1730_v10 = vld [vmem:[#allocation3 + $0xb8] sm:$0xff] }
 0x151   :  { %v639_v24 = vadd.f32 %v638_v25, %v525_v11  ;;  %v1732_v25 = vld [vmem:[#allocation3 + $0xa8] sm:$0xff] }
 0x152   :  { %1655 = vst [vmem:[#allocation9 + $0x130] sm:$0xff] %v1591_v0  ;;  %v1731_v0 = vld [vmem:[#allocation3 + $0xa0] sm:$0xff] }
 0x153   :  { %v751_v28 = vpop.f32.mrf.mxu2  ;;  %928 = vmatmul.f32.gmra.mxu0 %v1727_v23  ;;  %1041 = vmatmul.f32.gmra.mxu1 %v1728_v41  ;;  %v864_v43 = vpop.f32.mrf.mxu3 }
 0x154   :  { %v752_v9 = vadd.f32 %v751_v28, %v639_v24  ;;  %v1733_v28 = vld [vmem:[#allocation3 + $0xd0] sm:$0xff] }
 0x156   :  { %v865_v54 = vadd.f32 %v864_v43, %v752_v9 }
 0x158   :  { %v1593_v46 = vadd.f32 %v1928_v53, %v865_v54  ;;  %1157 = vmatmul.f32.gmra.mxu2 %v1729_v2  ;;  %v528_v42 = vpop.f32.mrf.mxu0  ;;  %v641_v59 = vpop.f32.mrf.mxu1  ;;  %1270 = vmatmul.f32.gmra.mxu3 %v1730_v10  ;;  %v1734_v54 = vld [vmem:[#allocation3 + $0xd8] sm:$0xff] }
 0x159   :  { %v642_v1 = vadd.f32 %v641_v59, %v528_v42  ;;  %v1736_v59 = vld [vmem:[#allocation3 + $0xc8] sm:$0xff] }
 0x15a   :  { %1657 = vst [vmem:[#allocation9 + $0x140] sm:$0xff] %v1593_v46  ;;  %v1735_v46 = vld [vmem:[#allocation3 + $0xc0] sm:$0xff] }
 0x15b   :  { %v754_v11 = vpop.f32.mrf.mxu2  ;;  %931 = vmatmul.f32.gmra.mxu0 %v1731_v0  ;;  %1044 = vmatmul.f32.gmra.mxu1 %v1732_v25  ;;  %v867_v16 = vpop.f32.mrf.mxu3 }
 0x15c   :  { %v755_v23 = vadd.f32 %v754_v11, %v642_v1  ;;  %v1737_v11 = vld [vmem:[#allocation3 + $0xf0] sm:$0xff] }
 0x15e   :  { %v868_v41 = vadd.f32 %v867_v16, %v755_v23 }
 0x160   :  { %v1595_v24 = vadd.f32 %v1928_v53, %v868_v41  ;;  %1160 = vmatmul.f32.gmra.mxu2 %v1733_v28  ;;  %v531_v43 = vpop.f32.mrf.mxu0  ;;  %v644_v9 = vpop.f32.mrf.mxu1  ;;  %1273 = vmatmul.f32.gmra.mxu3 %v1734_v54  ;;  %v1738_v41 = vld [vmem:[#allocation3 + $0xf8] sm:$0xff] }
 0x161   :  { %v645_v2 = vadd.f32 %v644_v9, %v531_v43  ;;  %v1740_v9 = vld [vmem:[#allocation3 + $0xe8] sm:$0xff] }
 0x162   :  { %1659 = vst [vmem:[#allocation9 + $0x150] sm:$0xff] %v1595_v24  ;;  %v1739_v24 = vld [vmem:[#allocation3 + $0xe0] sm:$0xff] }
 0x163   :  { %v757_v42 = vpop.f32.mrf.mxu2  ;;  %934 = vmatmul.f32.gmra.mxu0 %v1735_v46  ;;  %1047 = vmatmul.f32.gmra.mxu1 %v1736_v59  ;;  %v870_v10 = vpop.f32.mrf.mxu3 }
 0x164   :  { %v758_v0 = vadd.f32 %v757_v42, %v645_v2  ;;  %v1741_v42 = vld [vmem:[#allocation3 + $0x110] sm:$0xff] }
 0x166   :  { %v871_v25 = vadd.f32 %v870_v10, %v758_v0 }
 0x168   :  { %v1597_v1 = vadd.f32 %v1928_v53, %v871_v25  ;;  %1163 = vmatmul.f32.gmra.mxu2 %v1737_v11  ;;  %v534_v16 = vpop.f32.mrf.mxu0  ;;  %v647_v23 = vpop.f32.mrf.mxu1  ;;  %1276 = vmatmul.f32.gmra.mxu3 %v1738_v41  ;;  %v1742_v25 = vld [vmem:[#allocation3 + $0x118] sm:$0xff] }
 0x169   :  { %v648_v28 = vadd.f32 %v647_v23, %v534_v16  ;;  %v1744_v23 = vld [vmem:[#allocation3 + $0x108] sm:$0xff] }
 0x16a   :  { %1661 = vst [vmem:[#allocation9 + $0x160] sm:$0xff] %v1597_v1  ;;  %v1743_v1 = vld [vmem:[#allocation3 + $0x100] sm:$0xff] }
 0x16b   :  { %v760_v43 = vpop.f32.mrf.mxu2  ;;  %937 = vmatmul.f32.gmra.mxu0 %v1739_v24  ;;  %1050 = vmatmul.f32.gmra.mxu1 %v1740_v9  ;;  %v873_v54 = vpop.f32.mrf.mxu3 }
 0x16c   :  { %v761_v46 = vadd.f32 %v760_v43, %v648_v28  ;;  %v1745_v43 = vld [vmem:[#allocation3 + $0x130] sm:$0xff] }
 0x16e   :  { %v874_v59 = vadd.f32 %v873_v54, %v761_v46 }
 0x170   :  { %v1599_v2 = vadd.f32 %v1928_v53, %v874_v59  ;;  %1166 = vmatmul.f32.gmra.mxu2 %v1741_v42  ;;  %v537_v10 = vpop.f32.mrf.mxu0  ;;  %v650_v0 = vpop.f32.mrf.mxu1  ;;  %1279 = vmatmul.f32.gmra.mxu3 %v1742_v25  ;;  %v1746_v59 = vld [vmem:[#allocation3 + $0x138] sm:$0xff] }
 0x171   :  { %v651_v11 = vadd.f32 %v650_v0, %v537_v10  ;;  %v1748_v0 = vld [vmem:[#allocation3 + $0x128] sm:$0xff] }
 0x172   :  { %1663 = vst [vmem:[#allocation9 + $0x170] sm:$0xff] %v1599_v2  ;;  %v1747_v2 = vld [vmem:[#allocation3 + $0x120] sm:$0xff] }
 0x173   :  { %v763_v16 = vpop.f32.mrf.mxu2  ;;  %940 = vmatmul.f32.gmra.mxu0 %v1743_v1  ;;  %1053 = vmatmul.f32.gmra.mxu1 %v1744_v23  ;;  %v876_v41 = vpop.f32.mrf.mxu3 }
 0x174   :  { %v764_v24 = vadd.f32 %v763_v16, %v651_v11  ;;  %v1749_v16 = vld [vmem:[#allocation3 + $0x150] sm:$0xff] }
 0x176   :  { %v877_v9 = vadd.f32 %v876_v41, %v764_v24 }
 0x178   :  { %v1601_v28 = vadd.f32 %v1928_v53, %v877_v9  ;;  %1169 = vmatmul.f32.gmra.mxu2 %v1745_v43  ;;  %v540_v54 = vpop.f32.mrf.mxu0  ;;  %v653_v46 = vpop.f32.mrf.mxu1  ;;  %1282 = vmatmul.f32.gmra.mxu3 %v1746_v59  ;;  %v1750_v9 = vld [vmem:[#allocation3 + $0x158] sm:$0xff] }
 0x179   :  { %v654_v42 = vadd.f32 %v653_v46, %v540_v54  ;;  %v1752_v46 = vld [vmem:[#allocation3 + $0x148] sm:$0xff] }
 0x17a   :  { %1665 = vst [vmem:[#allocation9 + $0x180] sm:$0xff] %v1601_v28  ;;  %v1751_v28 = vld [vmem:[#allocation3 + $0x140] sm:$0xff] }
 0x17b   :  { %v766_v10 = vpop.f32.mrf.mxu2  ;;  %943 = vmatmul.f32.gmra.mxu0 %v1747_v2  ;;  %1056 = vmatmul.f32.gmra.mxu1 %v1748_v0  ;;  %v879_v25 = vpop.f32.mrf.mxu3 }
 0x17c   :  { %v767_v1 = vadd.f32 %v766_v10, %v654_v42  ;;  %v1753_v10 = vld [vmem:[#allocation3 + $0x170] sm:$0xff] }
 0x17e   :  { %v880_v23 = vadd.f32 %v879_v25, %v767_v1 }
 0x180   :  { %v1603_v11 = vadd.f32 %v1928_v53, %v880_v23  ;;  %1172 = vmatmul.f32.gmra.mxu2 %v1749_v16  ;;  %v543_v41 = vpop.f32.mrf.mxu0  ;;  %v656_v24 = vpop.f32.mrf.mxu1  ;;  %1285 = vmatmul.f32.gmra.mxu3 %v1750_v9  ;;  %v1754_v23 = vld [vmem:[#allocation3 + $0x178] sm:$0xff] }
 0x181   :  { %v657_v43 = vadd.f32 %v656_v24, %v543_v41  ;;  %v1756_v24 = vld [vmem:[#allocation3 + $0x168] sm:$0xff] }
 0x182   :  { %1667 = vst [vmem:[#allocation9 + $0x190] sm:$0xff] %v1603_v11  ;;  %v1755_v11 = vld [vmem:[#allocation3 + $0x160] sm:$0xff] }
 0x183   :  { %v769_v54 = vpop.f32.mrf.mxu2  ;;  %946 = vmatmul.f32.gmra.mxu0 %v1751_v28  ;;  %1059 = vmatmul.f32.gmra.mxu1 %v1752_v46  ;;  %v882_v59 = vpop.f32.mrf.mxu3 }
 0x184   :  { %v770_v2 = vadd.f32 %v769_v54, %v657_v43  ;;  %v1757_v54 = vld [vmem:[#allocation3 + $0x190] sm:$0xff] }
 0x186   :  { %v883_v0 = vadd.f32 %v882_v59, %v770_v2 }
 0x188   :  { %v1605_v42 = vadd.f32 %v1928_v53, %v883_v0  ;;  %1175 = vmatmul.f32.gmra.mxu2 %v1753_v10  ;;  %v546_v25 = vpop.f32.mrf.mxu0  ;;  %v659_v1 = vpop.f32.mrf.mxu1  ;;  %1288 = vmatmul.f32.gmra.mxu3 %v1754_v23  ;;  %v1758_v0 = vld [vmem:[#allocation3 + $0x198] sm:$0xff] }
 0x189   :  { %v660_v16 = vadd.f32 %v659_v1, %v546_v25  ;;  %v1760_v1 = vld [vmem:[#allocation3 + $0x188] sm:$0xff] }
 0x18a   :  { %1669 = vst [vmem:[#allocation9 + $0x1a0] sm:$0xff] %v1605_v42  ;;  %v1759_v42 = vld [vmem:[#allocation3 + $0x180] sm:$0xff] }
 0x18b   :  { %v772_v41 = vpop.f32.mrf.mxu2  ;;  %949 = vmatmul.f32.gmra.mxu0 %v1755_v11  ;;  %1062 = vmatmul.f32.gmra.mxu1 %v1756_v24  ;;  %v885_v9 = vpop.f32.mrf.mxu3 }
 0x18c   :  { %v773_v28 = vadd.f32 %v772_v41, %v660_v16  ;;  %v1761_v41 = vld [vmem:[#allocation3 + $0x1b0] sm:$0xff] }
 0x18e   :  { %v886_v46 = vadd.f32 %v885_v9, %v773_v28 }
 0x190   :  { %v1607_v43 = vadd.f32 %v1928_v53, %v886_v46  ;;  %1178 = vmatmul.f32.gmra.mxu2 %v1757_v54  ;;  %v549_v59 = vpop.f32.mrf.mxu0  ;;  %v662_v2 = vpop.f32.mrf.mxu1  ;;  %1291 = vmatmul.f32.gmra.mxu3 %v1758_v0  ;;  %v1762_v46 = vld [vmem:[#allocation3 + $0x1b8] sm:$0xff] }
 0x191   :  { %v663_v10 = vadd.f32 %v662_v2, %v549_v59  ;;  %v1764_v2 = vld [vmem:[#allocation3 + $0x1a8] sm:$0xff] }
 0x192   :  { %1671 = vst [vmem:[#allocation9 + $0x1b0] sm:$0xff] %v1607_v43  ;;  %v1763_v43 = vld [vmem:[#allocation3 + $0x1a0] sm:$0xff] }
 0x193   :  { %v775_v25 = vpop.f32.mrf.mxu2  ;;  %952 = vmatmul.f32.gmra.mxu0 %v1759_v42  ;;  %1065 = vmatmul.f32.gmra.mxu1 %v1760_v1  ;;  %v888_v23 = vpop.f32.mrf.mxu3 }
 0x194   :  { %v776_v11 = vadd.f32 %v775_v25, %v663_v10  ;;  %v1765_v25 = vld [vmem:[#allocation3 + $0x1d0] sm:$0xff] }
 0x196   :  { %v889_v24 = vadd.f32 %v888_v23, %v776_v11 }
 0x198   :  { %v1609_v16 = vadd.f32 %v1928_v53, %v889_v24  ;;  %1181 = vmatmul.f32.gmra.mxu2 %v1761_v41  ;;  %v552_v9 = vpop.f32.mrf.mxu0  ;;  %v665_v28 = vpop.f32.mrf.mxu1  ;;  %1294 = vmatmul.f32.gmra.mxu3 %v1762_v46  ;;  %v1766_v24 = vld [vmem:[#allocation3 + $0x1d8] sm:$0xff] }
 0x199   :  { %v666_v54 = vadd.f32 %v665_v28, %v552_v9  ;;  %v1768_v28 = vld [vmem:[#allocation3 + $0x1c8] sm:$0xff] }
 0x19a   :  { %1673 = vst [vmem:[#allocation9 + $0x1c0] sm:$0xff] %v1609_v16  ;;  %v1767_v16 = vld [vmem:[#allocation3 + $0x1c0] sm:$0xff] }
 0x19b   :  { %v778_v59 = vpop.f32.mrf.mxu2  ;;  %955 = vmatmul.f32.gmra.mxu0 %v1763_v43  ;;  %1068 = vmatmul.f32.gmra.mxu1 %v1764_v2  ;;  %v891_v0 = vpop.f32.mrf.mxu3 }
 0x19c   :  { %v779_v42 = vadd.f32 %v778_v59, %v666_v54  ;;  %v1769_v59 = vld [vmem:[#allocation3 + $0x1f0] sm:$0xff] }
 0x19e   :  { %v892_v1 = vadd.f32 %v891_v0, %v779_v42 }
 0x1a0   :  { %v1611_v10 = vadd.f32 %v1928_v53, %v892_v1  ;;  %1184 = vmatmul.f32.gmra.mxu2 %v1765_v25  ;;  %v555_v23 = vpop.f32.mrf.mxu0  ;;  %v668_v11 = vpop.f32.mrf.mxu1  ;;  %1297 = vmatmul.f32.gmra.mxu3 %v1766_v24  ;;  %v1770_v1 = vld [vmem:[#allocation3 + $0x1f8] sm:$0xff] }
 0x1a1   :  { %v669_v41 = vadd.f32 %v668_v11, %v555_v23  ;;  %v1772_v11 = vld [vmem:[#allocation3 + $0x1e8] sm:$0xff] }
 0x1a2   :  { %1675 = vst [vmem:[#allocation9 + $0x1d0] sm:$0xff] %v1611_v10  ;;  %v1771_v10 = vld [vmem:[#allocation3 + $0x1e0] sm:$0xff] }
 0x1a3   :  { %v781_v9 = vpop.f32.mrf.mxu2  ;;  %958 = vmatmul.f32.gmra.mxu0 %v1767_v16  ;;  %1071 = vmatmul.f32.gmra.mxu1 %v1768_v28  ;;  %v894_v46 = vpop.f32.mrf.mxu3 }
 0x1a4   :  { %v782_v43 = vadd.f32 %v781_v9, %v669_v41  ;;  %v1773_v9 = vld [vmem:[#allocation3 + $0x210] sm:$0xff] }
 0x1a6   :  { %v895_v2 = vadd.f32 %v894_v46, %v782_v43 }
 0x1a8   :  { %v1613_v54 = vadd.f32 %v1928_v53, %v895_v2  ;;  %1187 = vmatmul.f32.gmra.mxu2 %v1769_v59  ;;  %v558_v0 = vpop.f32.mrf.mxu0  ;;  %v671_v42 = vpop.f32.mrf.mxu1  ;;  %1300 = vmatmul.f32.gmra.mxu3 %v1770_v1  ;;  %v1774_v2 = vld [vmem:[#allocation3 + $0x218] sm:$0xff] }
 0x1a9   :  { %v672_v25 = vadd.f32 %v671_v42, %v558_v0  ;;  %v1776_v42 = vld [vmem:[#allocation3 + $0x208] sm:$0xff] }
 0x1aa   :  { %1677 = vst [vmem:[#allocation9 + $0x1e0] sm:$0xff] %v1613_v54  ;;  %v1775_v54 = vld [vmem:[#allocation3 + $0x200] sm:$0xff] }
 0x1ab   :  { %v784_v23 = vpop.f32.mrf.mxu2  ;;  %961 = vmatmul.f32.gmra.mxu0 %v1771_v10  ;;  %1074 = vmatmul.f32.gmra.mxu1 %v1772_v11  ;;  %v897_v24 = vpop.f32.mrf.mxu3  ;;  %v1777_v11 = vld [vmem:[#allocation8] sm:$0x3] }
 0x1ac   :  { %v785_v16 = vadd.f32 %v784_v23, %v672_v25  ;;  %v2118_v25 = vperm.slane %v1777_v11, 1 }
 0x1ae   :  { %v898_v28 = vadd.f32 %v897_v24, %v785_v16  ;;  %v1778_v24 = vld [vmem:[#allocation3 + $0x230] sm:$0xff] }
 0x1b0   :  { %v1615_v41 = vadd.f32 %v1928_v53, %v898_v28  ;;  %1190 = vmatmul.f32.gmra.mxu2 %v1773_v9  ;;  %v917_v46 = vpop.f32.mrf.mxu0  ;;  %v1030_v43 = vpop.f32.mrf.mxu1  ;;  %1303 = vmatmul.f32.gmra.mxu3 %v1774_v2  ;;  %v1779_v9 = vld [vmem:[#allocation3 + $0x238] sm:$0xff]  ;;  %v1781_v2 = vld [vmem:[#allocation3 + $0x228] sm:$0xff] }
 0x1b1   :  { %v1031_v59 = vadd.f32 %v1030_v43, %v917_v46  ;;  %v1780_v43 = vld [vmem:[#allocation3 + $0x220] sm:$0xff] }
 0x1b2   :  { %1679 = vst [vmem:[#allocation9 + $0x1f0] sm:$0xff] %v1615_v41 }
 0x1b3   :  { %v1143_v0 = vpop.f32.mrf.mxu2  ;;  %964 = vmatmul.f32.gmra.mxu0 %v1775_v54  ;;  %1077 = vmatmul.f32.gmra.mxu1 %v1776_v42  ;;  %v1256_v1 = vpop.f32.mrf.mxu3 }
 0x1b4   :  { %v1144_v10 = vadd.f32 %v1143_v0, %v1031_v59 }
 0x1b6   :  { %v1257_v23 = vadd.f32 %v1256_v1, %v1144_v10  ;;  %v1782_v1 = vld [vmem:[#allocation3 + $0x250] sm:$0xff] }
 0x1b8   :  { %v1554_v53 = vadd.f32 %v2118_v25, %v1257_v23  ;;  %1193 = vmatmul.f32.gmra.mxu2 %v1778_v24  ;;  %v920_v16 = vpop.f32.mrf.mxu0  ;;  %v1033_v28 = vpop.f32.mrf.mxu1  ;;  %1306 = vmatmul.f32.gmra.mxu3 %v1779_v9  ;;  %v1783_v23 = vld [vmem:[#allocation3 + $0x258] sm:$0xff] }
 0x1b9   :  { %v1034_v41 = vadd.f32 %v1033_v28, %v920_v16  ;;  %v1785_v28 = vld [vmem:[#allocation3 + $0x248] sm:$0xff] }
 0x1ba   :  { %1618 = vst [vmem:[#allocation9 + $0x8] sm:$0xff] %v1554_v53  ;;  %v1784_v53 = vld [vmem:[#allocation3 + $0x240] sm:$0xff] }
 0x1bb   :  { %v1146_v46 = vpop.f32.mrf.mxu2  ;;  %967 = vmatmul.f32.gmra.mxu0 %v1780_v43  ;;  %1080 = vmatmul.f32.gmra.mxu1 %v1781_v2  ;;  %v1259_v59 = vpop.f32.mrf.mxu3 }
 0x1bc   :  { %v1147_v0 = vadd.f32 %v1146_v46, %v1034_v41 }
 0x1be   :  { %v1260_v54 = vadd.f32 %v1259_v59, %v1147_v0 }
 0x1c0   :  { %v1556_v42 = vadd.f32 %v2118_v25, %v1260_v54  ;;  %1196 = vmatmul.f32.gmra.mxu2 %v1782_v1  ;;  %v923_v10 = vpop.f32.mrf.mxu0  ;;  %v1036_v11 = vpop.f32.mrf.mxu1  ;;  %1309 = vmatmul.f32.gmra.mxu3 %v1783_v23 }
 0x1c1   :  { %v1037_v24 = vadd.f32 %v1036_v11, %v923_v10 }
 0x1c2   :  { %1620 = vst [vmem:[#allocation9 + $0x18] sm:$0xff] %v1556_v42 }
 0x1c3   :  { %v1149_v16 = vpop.f32.mrf.mxu2  ;;  %970 = vmatmul.f32.gmra.mxu0 %v1784_v53  ;;  %1083 = vmatmul.f32.gmra.mxu1 %v1785_v28  ;;  %v1262_v9 = vpop.f32.mrf.mxu3 }
 0x1c4   :  { %v1150_v43 = vadd.f32 %v1149_v16, %v1037_v24 }
 0x1c6   :  { %v1263_v2 = vadd.f32 %v1262_v9, %v1150_v43 }
 0x1c8   :  { %v1558_v41 = vadd.f32 %v2118_v25, %v1263_v2  ;;  %1199 = vmatmul.f32.gmra.mxu2 %v1932_v20  ;;  %v926_v46 = vpop.f32.mrf.mxu0  ;;  %v1039_v59 = vpop.f32.mrf.mxu1  ;;  %1312 = vmatmul.f32.gmra.mxu3 %v1934_v21 }
 0x1c9   :  { %v1040_v0 = vadd.f32 %v1039_v59, %v926_v46 }
 0x1ca   :  { %1622 = vst [vmem:[#allocation9 + $0x28] sm:$0xff] %v1558_v41 }
 0x1cb   :  { %v1152_v54 = vpop.f32.mrf.mxu2  ;;  %973 = vmatmul.f32.gmra.mxu0 %v1939_v26  ;;  %1086 = vmatmul.f32.gmra.mxu1 %v1941_v27  ;;  %v1265_v42 = vpop.f32.mrf.mxu3 }
 0x1cc   :  { %v1153_v1 = vadd.f32 %v1152_v54, %v1040_v0 }
 0x1ce   :  { %v1266_v10 = vadd.f32 %v1265_v42, %v1153_v1 }
 0x1d0   :  { %v1560_v11 = vadd.f32 %v2118_v25, %v1266_v10  ;;  %1202 = vmatmul.f32.gmra.mxu2 %v1945_v32  ;;  %v929_v23 = vpop.f32.mrf.mxu0  ;;  %v1042_v20 = vpop.f32.mrf.mxu1  ;;  %1315 = vmatmul.f32.gmra.mxu3 %v1947_v33 }
 0x1d1   :  { %v1043_v24 = vadd.f32 %v1042_v20, %v929_v23 }
 0x1d2   :  { %1624 = vst [vmem:[#allocation9 + $0x38] sm:$0xff] %v1560_v11 }
 0x1d3   :  { %v1155_v21 = vpop.f32.mrf.mxu2  ;;  %976 = vmatmul.f32.gmra.mxu0 %v1952_v38  ;;  %1089 = vmatmul.f32.gmra.mxu1 %v1954_v39  ;;  %v1268_v26 = vpop.f32.mrf.mxu3 }
 0x1d4   :  { %v1156_v27 = vadd.f32 %v1155_v21, %v1043_v24 }
 0x1d6   :  { %v1269_v16 = vadd.f32 %v1268_v26, %v1156_v27 }
 0x1d8   :  { %v1562_v53 = vadd.f32 %v2118_v25, %v1269_v16  ;;  %1205 = vmatmul.f32.gmra.mxu2 %v1958_v48  ;;  %v932_v28 = vpop.f32.mrf.mxu0  ;;  %v1045_v32 = vpop.f32.mrf.mxu1  ;;  %1318 = vmatmul.f32.gmra.mxu3 %v1960_v49 }
 0x1d9   :  { %v1046_v9 = vadd.f32 %v1045_v32, %v932_v28 }
 0x1da   :  { %1626 = vst [vmem:[#allocation9 + $0x48] sm:$0xff] %v1562_v53 }
 0x1db   :  { %v1158_v33 = vpop.f32.mrf.mxu2  ;;  %979 = vmatmul.f32.gmra.mxu0 %v1965_v55  ;;  %1092 = vmatmul.f32.gmra.mxu1 %v1967_v56  ;;  %v1271_v38 = vpop.f32.mrf.mxu3 }
 0x1dc   :  { %v1159_v39 = vadd.f32 %v1158_v33, %v1046_v9 }
 0x1de   :  { %v1272_v43 = vadd.f32 %v1271_v38, %v1159_v39 }
 0x1e0   :  { %v1564_v2 = vadd.f32 %v2118_v25, %v1272_v43  ;;  %1208 = vmatmul.f32.gmra.mxu2 %v1971_v61  ;;  %v935_v41 = vpop.f32.mrf.mxu0  ;;  %v1048_v48 = vpop.f32.mrf.mxu1  ;;  %1321 = vmatmul.f32.gmra.mxu3 %v1973_v62 }
 0x1e1   :  { %v1049_v46 = vadd.f32 %v1048_v48, %v935_v41 }
 0x1e2   :  { %1628 = vst [vmem:[#allocation9 + $0x58] sm:$0xff] %v1564_v2 }
 0x1e3   :  { %v1161_v49 = vpop.f32.mrf.mxu2  ;;  %982 = vmatmul.f32.gmra.mxu0 %v1978_v3  ;;  %1095 = vmatmul.f32.gmra.mxu1 %v1980_v4  ;;  %v1274_v55 = vpop.f32.mrf.mxu3 }
 0x1e4   :  { %v1162_v56 = vadd.f32 %v1161_v49, %v1049_v46 }
 0x1e6   :  { %v1275_v59 = vadd.f32 %v1274_v55, %v1162_v56 }
 0x1e8   :  { %v1566_v0 = vadd.f32 %v2118_v25, %v1275_v59  ;;  %1211 = vmatmul.f32.gmra.mxu2 %v1984_v13  ;;  %v938_v54 = vpop.f32.mrf.mxu0  ;;  %v1051_v61 = vpop.f32.mrf.mxu1  ;;  %1324 = vmatmul.f32.gmra.mxu3 %v1986_v14 }
 0x1e9   :  { %v1052_v42 = vadd.f32 %v1051_v61, %v938_v54  ;;  %v2226_v61 = vld [vmem:[#allocation13_spill] sm:$0xff] }
 0x1ea   :  { %1630 = vst [vmem:[#allocation9 + $0x68] sm:$0xff] %v1566_v0 }
 0x1eb   :  { %v1164_v62 = vpop.f32.mrf.mxu2  ;;  %985 = vmatmul.f32.gmra.mxu0 %v1991_v19  ;;  %1098 = vmatmul.f32.gmra.mxu1 %v1993_v22  ;;  %v1277_v3 = vpop.f32.mrf.mxu3 }
 0x1ec   :  { %v1165_v4 = vadd.f32 %v1164_v62, %v1052_v42  ;;  %v2227_v42 = vld [vmem:[#allocation14_spill] sm:$0xff] }
 0x1ee   :  { %v1278_v1 = vadd.f32 %v1277_v3, %v1165_v4  ;;  %v2228_v4 = vld [vmem:[#allocation15_spill] sm:$0xff] }
 0x1f0   :  { %v1568_v10 = vadd.f32 %v2118_v25, %v1278_v1  ;;  %1214 = vmatmul.f32.gmra.mxu2 %v1997_v29  ;;  %v941_v11 = vpop.f32.mrf.mxu0  ;;  %v1054_v13 = vpop.f32.mrf.mxu1  ;;  %1327 = vmatmul.f32.gmra.mxu3 %v1999_v30 }
 0x1f1   :  { %v1055_v23 = vadd.f32 %v1054_v13, %v941_v11  ;;  %v2230_v13 = vld [vmem:[#allocation17_spill] sm:$0xff] }
 0x1f2   :  { %1632 = vst [vmem:[#allocation9 + $0x78] sm:$0xff] %v1568_v10  ;;  %v2229_v10 = vld [vmem:[#allocation16_spill] sm:$0xff] }
 0x1f3   :  { %v1167_v14 = vpop.f32.mrf.mxu2  ;;  %988 = vmatmul.f32.gmra.mxu0 %v2004_v37  ;;  %1101 = vmatmul.f32.gmra.mxu1 %v2006_v40  ;;  %v1280_v19 = vpop.f32.mrf.mxu3 }
 0x1f4   :  { %v1168_v22 = vadd.f32 %v1167_v14, %v1055_v23  ;;  %v2231_v23 = vld [vmem:[#allocation18_spill] sm:$0xff] }
 0x1f6   :  { %v1281_v20 = vadd.f32 %v1280_v19, %v1168_v22 }
 0x1f8   :  { %v1570_v24 = vadd.f32 %v2118_v25, %v1281_v20  ;;  %1217 = vmatmul.f32.gmra.mxu2 %v2010_v51  ;;  %v944_v21 = vpop.f32.mrf.mxu0  ;;  %v1057_v29 = vpop.f32.mrf.mxu1  ;;  %1330 = vmatmul.f32.gmra.mxu3 %v2012_v52 }
 0x1f9   :  { %v1058_v26 = vadd.f32 %v1057_v29, %v944_v21 }
 0x1fa   :  { %1634 = vst [vmem:[#allocation9 + $0x88] sm:$0xff] %v1570_v24 }
 0x1fb   :  { %v1170_v30 = vpop.f32.mrf.mxu2  ;;  %991 = vmatmul.f32.gmra.mxu0 %v2017_v60  ;;  %1104 = vmatmul.f32.gmra.mxu1 %v2019_v63  ;;  %v1283_v37 = vpop.f32.mrf.mxu3 }
 0x1fc   :  { %v1171_v40 = vadd.f32 %v1170_v30, %v1058_v26 }
 0x1fe   :  { %v1284_v27 = vadd.f32 %v1283_v37, %v1171_v40 }
 0x200   :  { %v1572_v16 = vadd.f32 %v2118_v25, %v1284_v27  ;;  %1220 = vmatmul.f32.gmra.mxu2 %v2023_v6  ;;  %v947_v53 = vpop.f32.mrf.mxu0  ;;  %v1060_v51 = vpop.f32.mrf.mxu1  ;;  %1333 = vmatmul.f32.gmra.mxu3 %v2025_v7 }
 0x201   :  { %v1061_v28 = vadd.f32 %v1060_v51, %v947_v53 }
 0x202   :  { %1636 = vst [vmem:[#allocation9 + $0x98] sm:$0xff] %v1572_v16 }
 0x203   :  { %v1173_v52 = vpop.f32.mrf.mxu2  ;;  %994 = vmatmul.f32.gmra.mxu0 %v2030_v12  ;;  %1107 = vmatmul.f32.gmra.mxu1 %v2032_v15  ;;  %v1286_v60 = vpop.f32.mrf.mxu3 }
 0x204   :  { %v1174_v63 = vadd.f32 %v1173_v52, %v1061_v28 }
 0x206   :  { %v1287_v32 = vadd.f32 %v1286_v60, %v1174_v63 }
 0x208   :  { %v1574_v9 = vadd.f32 %v2118_v25, %v1287_v32  ;;  %1223 = vmatmul.f32.gmra.mxu2 %v2036_v34  ;;  %v950_v33 = vpop.f32.mrf.mxu0  ;;  %v1063_v6 = vpop.f32.mrf.mxu1  ;;  %1336 = vmatmul.f32.gmra.mxu3 %v2038_v35 }
 0x209   :  { %v1064_v38 = vadd.f32 %v1063_v6, %v950_v33 }
 0x20a   :  { %1638 = vst [vmem:[#allocation9 + $0xa8] sm:$0xff] %v1574_v9 }
 0x20b   :  { %v1176_v7 = vpop.f32.mrf.mxu2  ;;  %997 = vmatmul.f32.gmra.mxu0 %v2043_v44  ;;  %1110 = vmatmul.f32.gmra.mxu1 %v2045_v45  ;;  %v1289_v12 = vpop.f32.mrf.mxu3 }
 0x20c   :  { %v1177_v15 = vadd.f32 %v1176_v7, %v1064_v38 }
 0x20e   :  { %v1290_v39 = vadd.f32 %v1289_v12, %v1177_v15 }
 0x210   :  { %v1576_v43 = vadd.f32 %v2118_v25, %v1290_v39  ;;  %1226 = vmatmul.f32.gmra.mxu2 %v2049_v57  ;;  %v953_v2 = vpop.f32.mrf.mxu0  ;;  %v1066_v34 = vpop.f32.mrf.mxu1  ;;  %1339 = vmatmul.f32.gmra.mxu3 %v2051_v58 }
 0x211   :  { %v1067_v41 = vadd.f32 %v1066_v34, %v953_v2 }
 0x212   :  { %1640 = vst [vmem:[#allocation9 + $0xb8] sm:$0xff] %v1576_v43 }
 0x213   :  { %v1179_v35 = vpop.f32.mrf.mxu2  ;;  %1000 = vmatmul.f32.gmra.mxu0 %v2056_v5  ;;  %1113 = vmatmul.f32.gmra.mxu1 %v2058_v8  ;;  %v1292_v44 = vpop.f32.mrf.mxu3 }
 0x214   :  { %v1180_v45 = vadd.f32 %v1179_v35, %v1067_v41 }
 0x216   :  { %v1293_v48 = vadd.f32 %v1292_v44, %v1180_v45 }
 0x218   :  { %v1578_v46 = vadd.f32 %v2118_v25, %v1293_v48  ;;  %1229 = vmatmul.f32.gmra.mxu2 %v2062_v17  ;;  %v956_v49 = vpop.f32.mrf.mxu0  ;;  %v1069_v57 = vpop.f32.mrf.mxu1  ;;  %1342 = vmatmul.f32.gmra.mxu3 %v2064_v18 }
 0x219   :  { %v1070_v55 = vadd.f32 %v1069_v57, %v956_v49 }
 0x21a   :  { %1642 = vst [vmem:[#allocation9 + $0xc8] sm:$0xff] %v1578_v46 }
 0x21b   :  { %v1182_v58 = vpop.f32.mrf.mxu2  ;;  %1003 = vmatmul.f32.gmra.mxu0 %v2069_v31  ;;  %1116 = vmatmul.f32.gmra.mxu1 %v2071_v36  ;;  %v1295_v5 = vpop.f32.mrf.mxu3 }
 0x21c   :  { %v1183_v8 = vadd.f32 %v1182_v58, %v1070_v55 }
 0x21e   :  { %v1296_v56 = vadd.f32 %v1295_v5, %v1183_v8 }
 0x220   :  { %v1580_v59 = vadd.f32 %v2118_v25, %v1296_v56  ;;  %1232 = vmatmul.f32.gmra.mxu2 %v2075_v47  ;;  %v959_v0 = vpop.f32.mrf.mxu0  ;;  %v1072_v17 = vpop.f32.mrf.mxu1  ;;  %1345 = vmatmul.f32.gmra.mxu3 %v2077_v50 }
 0x221   :  { %v1073_v54 = vadd.f32 %v1072_v17, %v959_v0 }
 0x222   :  { %1644 = vst [vmem:[#allocation9 + $0xd8] sm:$0xff] %v1580_v59 }
 0x223   :  { %v1185_v18 = vpop.f32.mrf.mxu2  ;;  %1006 = vmatmul.f32.gmra.mxu0 %v2226_v61  ;;  %1119 = vmatmul.f32.gmra.mxu1 %v2227_v42  ;;  %v1298_v31 = vpop.f32.mrf.mxu3 }
 0x224   :  { %v1186_v36 = vadd.f32 %v1185_v18, %v1073_v54 }
 0x226   :  { %v1299_v62 = vadd.f32 %v1298_v31, %v1186_v36 }
 0x228   :  { %v1582_v3 = vadd.f32 %v2118_v25, %v1299_v62  ;;  %1235 = vmatmul.f32.gmra.mxu2 %v2228_v4  ;;  %v962_v1 = vpop.f32.mrf.mxu0  ;;  %v1075_v47 = vpop.f32.mrf.mxu1  ;;  %1348 = vmatmul.f32.gmra.mxu3 %v2229_v10 }
 0x229   :  { %v1076_v11 = vadd.f32 %v1075_v47, %v962_v1 }
 0x22a   :  { %1646 = vst [vmem:[#allocation9 + $0xe8] sm:$0xff] %v1582_v3 }
 0x22b   :  { %v1188_v50 = vpop.f32.mrf.mxu2  ;;  %1009 = vmatmul.f32.gmra.mxu0 %v2230_v13  ;;  %1122 = vmatmul.f32.gmra.mxu1 %v2231_v23  ;;  %v1301_v14 = vpop.f32.mrf.mxu3 }
 0x22c   :  { %v1189_v19 = vadd.f32 %v1188_v50, %v1076_v11 }
 0x22e   :  { %v1302_v22 = vadd.f32 %v1301_v14, %v1189_v19 }
 0x230   :  { %v1584_v20 = vadd.f32 %v2118_v25, %v1302_v22  ;;  %v965_v24 = vpop.f32.mrf.mxu0  ;;  %v1078_v21 = vpop.f32.mrf.mxu1 }
 0x231   :  { %v1079_v29 = vadd.f32 %v1078_v21, %v965_v24 }
 0x232   :  { %1648 = vst [vmem:[#allocation9 + $0xf8] sm:$0xff] %v1584_v20 }
 0x233   :  { %v1191_v26 = vpop.f32.mrf.mxu2  ;;  %v1304_v30 = vpop.f32.mrf.mxu3 }
 0x234   :  { %v1192_v37 = vadd.f32 %v1191_v26, %v1079_v29 }
 0x236   :  { %v1305_v40 = vadd.f32 %v1304_v30, %v1192_v37 }
 0x238   :  { %v1586_v27 = vadd.f32 %v2118_v25, %v1305_v40  ;;  %v968_v16 = vpop.f32.mrf.mxu0  ;;  %v1081_v53 = vpop.f32.mrf.mxu1 }
 0x239   :  { %v1082_v51 = vadd.f32 %v1081_v53, %v968_v16 }
 0x23a   :  { %1650 = vst [vmem:[#allocation9 + $0x108] sm:$0xff] %v1586_v27 }
 0x23b   :  { %v1194_v28 = vpop.f32.mrf.mxu2  ;;  %v1307_v52 = vpop.f32.mrf.mxu3 }
 0x23c   :  { %v1195_v60 = vadd.f32 %v1194_v28, %v1082_v51 }
 0x23e   :  { %v1308_v63 = vadd.f32 %v1307_v52, %v1195_v60 }
 0x240   :  { %v1588_v32 = vadd.f32 %v2118_v25, %v1308_v63  ;;  %v971_v9 = vpop.f32.mrf.mxu0  ;;  %v1084_v33 = vpop.f32.mrf.mxu1 }
 0x241   :  { %v1085_v6 = vadd.f32 %v1084_v33, %v971_v9 }
 0x242   :  { %1652 = vst [vmem:[#allocation9 + $0x118] sm:$0xff] %v1588_v32 }
 0x243   :  { %v1197_v38 = vpop.f32.mrf.mxu2  ;;  %v1310_v7 = vpop.f32.mrf.mxu3 }
 0x244   :  { %v1198_v12 = vadd.f32 %v1197_v38, %v1085_v6 }
 0x246   :  { %v1311_v15 = vadd.f32 %v1310_v7, %v1198_v12 }
 0x248   :  { %v1590_v39 = vadd.f32 %v2118_v25, %v1311_v15  ;;  %v974_v43 = vpop.f32.mrf.mxu0  ;;  %v1087_v2 = vpop.f32.mrf.mxu1 }
 0x249   :  { %v1088_v34 = vadd.f32 %v1087_v2, %v974_v43 }
 0x24a   :  { %1654 = vst [vmem:[#allocation9 + $0x128] sm:$0xff] %v1590_v39 }
 0x24b   :  { %v1200_v41 = vpop.f32.mrf.mxu2  ;;  %v1313_v35 = vpop.f32.mrf.mxu3 }
 0x24c   :  { %v1201_v44 = vadd.f32 %v1200_v41, %v1088_v34 }
 0x24e   :  { %v1314_v45 = vadd.f32 %v1313_v35, %v1201_v44 }
 0x250   :  { %v1592_v48 = vadd.f32 %v2118_v25, %v1314_v45  ;;  %v977_v46 = vpop.f32.mrf.mxu0  ;;  %v1090_v49 = vpop.f32.mrf.mxu1 }
 0x251   :  { %v1091_v57 = vadd.f32 %v1090_v49, %v977_v46 }
 0x252   :  { %1656 = vst [vmem:[#allocation9 + $0x138] sm:$0xff] %v1592_v48 }
 0x253   :  { %v1203_v55 = vpop.f32.mrf.mxu2  ;;  %v1316_v58 = vpop.f32.mrf.mxu3 }
 0x254   :  { %v1204_v5 = vadd.f32 %v1203_v55, %v1091_v57 }
 0x256   :  { %v1317_v8 = vadd.f32 %v1316_v58, %v1204_v5 }
 0x258   :  { %v1594_v56 = vadd.f32 %v2118_v25, %v1317_v8  ;;  %v980_v59 = vpop.f32.mrf.mxu0  ;;  %v1093_v0 = vpop.f32.mrf.mxu1 }
 0x259   :  { %v1094_v17 = vadd.f32 %v1093_v0, %v980_v59 }
 0x25a   :  { %1658 = vst [vmem:[#allocation9 + $0x148] sm:$0xff] %v1594_v56 }
 0x25b   :  { %v1206_v54 = vpop.f32.mrf.mxu2  ;;  %v1319_v18 = vpop.f32.mrf.mxu3 }
 0x25c   :  { %v1207_v61 = vadd.f32 %v1206_v54, %v1094_v17 }
 0x25e   :  { %v1320_v42 = vadd.f32 %v1319_v18, %v1207_v61 }
 0x260   :  { %v1596_v31 = vadd.f32 %v2118_v25, %v1320_v42  ;;  %v983_v36 = vpop.f32.mrf.mxu0  ;;  %v1096_v62 = vpop.f32.mrf.mxu1 }
 0x261   :  { %v1097_v3 = vadd.f32 %v1096_v62, %v983_v36 }
 0x262   :  { %1660 = vst [vmem:[#allocation9 + $0x158] sm:$0xff] %v1596_v31 }
 0x263   :  { %v1209_v4 = vpop.f32.mrf.mxu2  ;;  %v1322_v1 = vpop.f32.mrf.mxu3 }
 0x264   :  { %v1210_v47 = vadd.f32 %v1209_v4, %v1097_v3 }
 0x266   :  { %v1323_v10 = vadd.f32 %v1322_v1, %v1210_v47 }
 0x268   :  { %v1598_v11 = vadd.f32 %v2118_v25, %v1323_v10  ;;  %v986_v50 = vpop.f32.mrf.mxu0  ;;  %v1099_v13 = vpop.f32.mrf.mxu1 }
 0x269   :  { %v1100_v23 = vadd.f32 %v1099_v13, %v986_v50 }
 0x26a   :  { %1662 = vst [vmem:[#allocation9 + $0x168] sm:$0xff] %v1598_v11 }
 0x26b   :  { %v1212_v14 = vpop.f32.mrf.mxu2  ;;  %v1325_v19 = vpop.f32.mrf.mxu3 }
 0x26c   :  { %v1213_v22 = vadd.f32 %v1212_v14, %v1100_v23 }
 0x26e   :  { %v1326_v20 = vadd.f32 %v1325_v19, %v1213_v22 }
 0x270   :  { %v1600_v24 = vadd.f32 %v2118_v25, %v1326_v20  ;;  %v989_v21 = vpop.f32.mrf.mxu0  ;;  %v1102_v29 = vpop.f32.mrf.mxu1 }
 0x271   :  { %v1103_v26 = vadd.f32 %v1102_v29, %v989_v21 }
 0x272   :  { %1664 = vst [vmem:[#allocation9 + $0x178] sm:$0xff] %v1600_v24 }
 0x273   :  { %v1215_v30 = vpop.f32.mrf.mxu2  ;;  %v1328_v37 = vpop.f32.mrf.mxu3 }
 0x274   :  { %v1216_v40 = vadd.f32 %v1215_v30, %v1103_v26 }
 0x276   :  { %v1329_v27 = vadd.f32 %v1328_v37, %v1216_v40 }
 0x278   :  { %v1602_v16 = vadd.f32 %v2118_v25, %v1329_v27  ;;  %v992_v53 = vpop.f32.mrf.mxu0  ;;  %v1105_v51 = vpop.f32.mrf.mxu1 }
 0x279   :  { %v1106_v28 = vadd.f32 %v1105_v51, %v992_v53 }
 0x27a   :  { %1666 = vst [vmem:[#allocation9 + $0x188] sm:$0xff] %v1602_v16 }
 0x27b   :  { %v1218_v52 = vpop.f32.mrf.mxu2  ;;  %v1331_v60 = vpop.f32.mrf.mxu3 }
 0x27c   :  { %v1219_v63 = vadd.f32 %v1218_v52, %v1106_v28 }
 0x27e   :  { %v1332_v32 = vadd.f32 %v1331_v60, %v1219_v63 }
 0x280   :  { %v1604_v9 = vadd.f32 %v2118_v25, %v1332_v32  ;;  %v995_v33 = vpop.f32.mrf.mxu0  ;;  %v1108_v6 = vpop.f32.mrf.mxu1 }
 0x281   :  { %v1109_v38 = vadd.f32 %v1108_v6, %v995_v33 }
 0x282   :  { %1668 = vst [vmem:[#allocation9 + $0x198] sm:$0xff] %v1604_v9 }
 0x283   :  { %v1221_v7 = vpop.f32.mrf.mxu2  ;;  %v1334_v12 = vpop.f32.mrf.mxu3 }
 0x284   :  { %v1222_v15 = vadd.f32 %v1221_v7, %v1109_v38 }
 0x286   :  { %v1335_v39 = vadd.f32 %v1334_v12, %v1222_v15 }
 0x288   :  { %v1606_v43 = vadd.f32 %v2118_v25, %v1335_v39  ;;  %v998_v2 = vpop.f32.mrf.mxu0  ;;  %v1111_v34 = vpop.f32.mrf.mxu1 }
 0x289   :  { %v1112_v41 = vadd.f32 %v1111_v34, %v998_v2 }
 0x28a   :  { %1670 = vst [vmem:[#allocation9 + $0x1a8] sm:$0xff] %v1606_v43 }
 0x28b   :  { %v1224_v35 = vpop.f32.mrf.mxu2  ;;  %v1337_v44 = vpop.f32.mrf.mxu3 }
 0x28c   :  { %v1225_v45 = vadd.f32 %v1224_v35, %v1112_v41 }
 0x28e   :  { %v1338_v48 = vadd.f32 %v1337_v44, %v1225_v45 }
 0x290   :  { %v1608_v46 = vadd.f32 %v2118_v25, %v1338_v48  ;;  %v1001_v49 = vpop.f32.mrf.mxu0  ;;  %v1114_v57 = vpop.f32.mrf.mxu1 }
 0x291   :  { %v1115_v55 = vadd.f32 %v1114_v57, %v1001_v49 }
 0x292   :  { %1672 = vst [vmem:[#allocation9 + $0x1b8] sm:$0xff] %v1608_v46 }
 0x293   :  { %v1227_v58 = vpop.f32.mrf.mxu2  ;;  %v1340_v5 = vpop.f32.mrf.mxu3 }
 0x294   :  { %v1228_v8 = vadd.f32 %v1227_v58, %v1115_v55 }
 0x296   :  { %v1341_v56 = vadd.f32 %v1340_v5, %v1228_v8 }
 0x298   :  { %v1610_v59 = vadd.f32 %v2118_v25, %v1341_v56  ;;  %v1004_v0 = vpop.f32.mrf.mxu0  ;;  %v1117_v17 = vpop.f32.mrf.mxu1 }
 0x299   :  { %v1118_v54 = vadd.f32 %v1117_v17, %v1004_v0 }
 0x29a   :  { %1674 = vst [vmem:[#allocation9 + $0x1c8] sm:$0xff] %v1610_v59 }
 0x29b   :  { %v1230_v18 = vpop.f32.mrf.mxu2  ;;  %v1343_v61 = vpop.f32.mrf.mxu3 }
 0x29c   :  { %v1231_v42 = vadd.f32 %v1230_v18, %v1118_v54 }
 0x29e   :  { %v1344_v31 = vadd.f32 %v1343_v61, %v1231_v42 }
 0x2a0   :  { %v1612_v36 = vadd.f32 %v2118_v25, %v1344_v31  ;;  %v1007_v62 = vpop.f32.mrf.mxu0  ;;  %v1120_v3 = vpop.f32.mrf.mxu1 }
 0x2a1   :  { %v1121_v4 = vadd.f32 %v1120_v3, %v1007_v62 }
 0x2a2   :  { %1676 = vst [vmem:[#allocation9 + $0x1d8] sm:$0xff] %v1612_v36 }
 0x2a3   :  { %v1233_v1 = vpop.f32.mrf.mxu2  ;;  %v1346_v47 = vpop.f32.mrf.mxu3 }
 0x2a4   :  { %v1234_v10 = vadd.f32 %v1233_v1, %v1121_v4 }
 0x2a6   :  { %v1347_v11 = vadd.f32 %v1346_v47, %v1234_v10 }
 0x2a8   :  { %v1614_v50 = vadd.f32 %v2118_v25, %v1347_v11  ;;  %v1010_v13 = vpop.f32.mrf.mxu0  ;;  %v1123_v23 = vpop.f32.mrf.mxu1 }
 0x2a9   :  { %v1124_v14 = vadd.f32 %v1123_v23, %v1010_v13 }
 0x2aa   :  { %1678 = vst [vmem:[#allocation9 + $0x1e8] sm:$0xff] %v1614_v50 }
 0x2ab   :  { %v1236_v19 = vpop.f32.mrf.mxu2  ;;  %v1349_v22 = vpop.f32.mrf.mxu3 }
 0x2ac   :  { %v1237_v20 = vadd.f32 %v1236_v19, %v1124_v14 }
 0x2ae   :  { %v1350_v24 = vadd.f32 %v1349_v22, %v1237_v20 }
 0x2b0   :  { %v1616_v21 = vadd.f32 %v2118_v25, %v1350_v24 }
 0x2b2   :  { %1680 = vst [vmem:[#allocation9 + $0x1f8] sm:$0xff] %v1616_v21 }
 0x2b3   :  { %1693 = dma.vmem_to_hbm [thread:$0]  %s1686_s29, 8192, %s1688_s5, [#allocation5], %s1889_s20, %s1889_s20, %s1890_s21  }
 0x2b4   :  { %1886 = dma.done.wait [#allocation5], 8192  }
 0x2b5   :  { %1887 = vsyncadd [#allocation5], 4294959104 }
 0x2b6   :  { %1698 = vsyncpa [#allocation4], 1 }
 0x2b7   :  { %1699 = vsyncpa [#allocation7], 1 }
 0x2b8   :  { %1700 = vsyncpa [#allocation5], 1 }

</bundles_post_ra>
